<compile_context>
chip_gen: v7x
topology: tpu7x:2x2x1
jax: 0.10.0
libtpu: 0.0.40
codegen_flags: <defaults>
</compile_context>

<pallas_src>
import jax
import jax.numpy as jnp
from jax.experimental import pallas as pl
from jax.experimental.pallas import tpu as pltpu

# ----------------------------- model config ---------------------------------
VOCAB = 128
MAX_POS = 64
HIDDEN = 32
N_HEADS = 2
HEAD_DIM = HIDDEN // N_HEADS
FFN = 64
N_LAYERS = 2
EPS = 1e-12  # BERT LayerNorm eps


def _layernorm(x, g, b):
    mu = jnp.mean(x, axis=-1, keepdims=True)
    var = jnp.mean((x - mu) ** 2, axis=-1, keepdims=True)
    return (x - mu) * jax.lax.rsqrt(var + EPS) * g + b


# ------------------------- fused forward kernel ------------------------------
def _make_kernel(B, S):
    H, NH, HD = HIDDEN, N_HEADS, HEAD_DIM
    scale = 1.0 / (HD ** 0.5)

    def kernel(ids_ref, wemb_ref, pemb_ref, temb_ref, eg_ref, eb_ref,
               wqkv_ref, bqkv_ref, wo_ref, bo_ref,
               ln1g_ref, ln1b_ref, w1_ref, b1_ref,
               w2_ref, b2_ref, ln2g_ref, ln2b_ref,
               o_ref):
        # ---- fused embedding: SMEM ids drive per-row pl.ds gathers ----------
        rows = []
        for b in range(B):
            for s in range(S):
                tok = ids_ref[b * S + s]                       # scalar (SMEM)
                rows.append(wemb_ref[pl.ds(tok, 1), :])        # (1, H) row
        emb = jnp.concatenate(rows, axis=0)                    # (B*S, H)
        pos_blk = pemb_ref[0:S, :]                             # (S, H)
        pos = jnp.concatenate([pos_blk] * B, axis=0)           # (B*S, H)
        emb = emb + pos + temb_ref[0:1, :]                     # token_type_id 0
        h2 = _layernorm(emb, eg_ref[...], eb_ref[...])         # (B*S, H) f32

        # Head split/merge via static slices + leading stack/concat only.
        def split_heads(qkv2d, col0):       # (B*S, 3H) -> (B*NH, S, HD)
            parts = [qkv2d[b * S:(b + 1) * S,
                           col0 + h * HD: col0 + (h + 1) * HD]
                     for b in range(B) for h in range(NH)]
            return jnp.stack(parts, axis=0)

        def merge_heads(x):                 # (B*NH, S, HD) -> (B*S, H)
            return jnp.concatenate(
                [jnp.concatenate([x[b * NH + h] for h in range(NH)], axis=-1)
                 for b in range(B)], axis=0)

        for li in range(N_LAYERS):          # unrolled; static layer indexing
            wqkv, bqkv = wqkv_ref[li], bqkv_ref[li]
            wo, bo = wo_ref[li], bo_ref[li]
            ln1g, ln1b = ln1g_ref[li], ln1b_ref[li]
            w1, b1 = w1_ref[li], b1_ref[li]
            w2, b2 = w2_ref[li], b2_ref[li]
            ln2g, ln2b = ln2g_ref[li], ln2b_ref[li]

            # Fused QKV projection: single (B*S, H) @ (H, 3H) matmul (f32).
            qkv = jnp.dot(h2, wqkv, preferred_element_type=jnp.float32) + bqkv

            qh = split_heads(qkv, 0)        # (B*NH, S, HD)
            kh = split_heads(qkv, H)
            vh = split_heads(qkv, 2 * H)

            # One batched einsum pair over the merged (batch, head) axis.
            sc = jnp.einsum('bqd,bkd->bqk', qh, kh,
                            preferred_element_type=jnp.float32) * scale
            sc = sc - jnp.max(sc, axis=-1, keepdims=True)
            p = jnp.exp(sc)
            p = p * pl.reciprocal(jnp.sum(p, axis=-1, keepdims=True),
                                  approx=True)
            ctx = jnp.einsum('bqk,bkd->bqd', p, vh,
                             preferred_element_type=jnp.float32)
            ctx2 = merge_heads(ctx)         # (B*S, H)

            # Single output projection over the full hidden dim.
            attn = jnp.dot(ctx2, wo, preferred_element_type=jnp.float32) + bo
            h1 = _layernorm(h2 + attn, ln1g, ln1b)

            # FFN (GELU) as two 2-D matmuls.
            ff = jnp.dot(h1, w1, preferred_element_type=jnp.float32) + b1
            # TODO(synk): HF BERT uses exact erf GELU; tanh approx kept since
            # no checkpoint is loaded and bit-exact matching is not required.
            ff = jax.nn.gelu(ff, approximate=True)
            ff = jnp.dot(ff, w2, preferred_element_type=jnp.float32) + b2
            h2 = _layernorm(h1 + ff, ln2g, ln2b)

        # (B*S, H) store; wrapper reshapes to (B, S, H).
        o_ref[...] = h2.astype(o_ref.dtype)

    return kernel


# ------------------------------ parameters -----------------------------------
def init_params(key):
    def nrm(k, shape):
        return 0.02 * jax.random.normal(k, shape, jnp.float32)

    keys = jax.random.split(key, 4 + N_LAYERS)
    params = {
        'word_emb': nrm(keys[0], (VOCAB, HIDDEN)),
        'pos_emb': nrm(keys[1], (MAX_POS, HIDDEN)),
        'type_emb': nrm(keys[2], (2, HIDDEN)),
        'emb_ln_g': jnp.ones((1, HIDDEN), jnp.float32),
        'emb_ln_b': jnp.zeros((1, HIDDEN), jnp.float32),
    }
    wqkv, bqkv, wo, bo = [], [], [], []
    ln1g, ln1b, w1, b1, w2, b2, ln2g, ln2b = ([] for _ in range(8))
    for li in range(N_LAYERS):
        lk = jax.random.split(keys[4 + li], 6)
        wq = nrm(lk[0], (HIDDEN, HIDDEN))
        wk = nrm(lk[1], (HIDDEN, HIDDEN))
        wv = nrm(lk[2], (HIDDEN, HIDDEN))
        wqkv.append(jnp.concatenate([wq, wk, wv], axis=1))      # (H, 3H)
        bqkv.append(jnp.zeros((1, 3 * HIDDEN), jnp.float32))
        wo.append(nrm(lk[3], (HIDDEN, HIDDEN)))
        bo.append(jnp.zeros((1, HIDDEN), jnp.float32))
        ln1g.append(jnp.ones((1, HIDDEN), jnp.float32))
        ln1b.append(jnp.zeros((1, HIDDEN), jnp.float32))
        w1.append(nrm(lk[4], (HIDDEN, FFN)))
        b1.append(jnp.zeros((1, FFN), jnp.float32))
        w2.append(nrm(lk[5], (FFN, HIDDEN)))
        b2.append(jnp.zeros((1, HIDDEN), jnp.float32))
        ln2g.append(jnp.ones((1, HIDDEN), jnp.float32))
        ln2b.append(jnp.zeros((1, HIDDEN), jnp.float32))
    params['stacked'] = {
        'wqkv': jnp.stack(wqkv), 'bqkv': jnp.stack(bqkv),
        'wo': jnp.stack(wo), 'bo': jnp.stack(bo),
        'ln1_g': jnp.stack(ln1g), 'ln1_b': jnp.stack(ln1b),
        'w1': jnp.stack(w1), 'b1': jnp.stack(b1),
        'w2': jnp.stack(w2), 'b2': jnp.stack(b2),
        'ln2_g': jnp.stack(ln2g), 'ln2_b': jnp.stack(ln2b),
    }
    return params


# ------------------------------- forward --------------------------------------
def disaster_tweet_classifier_forward(params, input_ids):
    """Equivalent of DisasterTweetClassifier.forward: self.model(input_ids)[0]."""
    B, S = input_ids.shape
    L = params['stacked']
    # ids flattened to 1-D (SMEM pads 1-D arrays far less than 2-D ones).
    args = (input_ids.reshape(-1).astype(jnp.int32),
            params['word_emb'], params['pos_emb'], params['type_emb'],
            params['emb_ln_g'], params['emb_ln_b'],
            L['wqkv'], L['bqkv'], L['wo'], L['bo'],
            L['ln1_g'], L['ln1_b'], L['w1'], L['b1'],
            L['w2'], L['b2'], L['ln2_g'], L['ln2_b'])

    smem = pl.BlockSpec(memory_space=pltpu.MemorySpace.SMEM)
    vmem = pl.BlockSpec(memory_space=pltpu.MemorySpace.VMEM)

    # Single fused, UNgridded pallas_call: ids in SMEM, weights/tables as
    # whole-array VMEM blocks (total working set ~60 KB << VMEM on all gens).
    out2d = pl.pallas_call(
        _make_kernel(B, S),
        out_shape=jax.ShapeDtypeStruct((B * S, HIDDEN), jnp.float32),
        in_specs=[smem] + [vmem] * (len(args) - 1),
        out_specs=vmem,
    )(*args)
    return out2d.reshape(B, S, HIDDEN)


# TODO(synk): tokenizer / pandas CSV loading / train-val split / CrossEntropyLoss
# training steps are host-side data plumbing with no Pallas equivalent; only the
# forward pass (model(input_ids)[0], all-ones attention mask) is a TPU kernel.

if __name__ == "__main__":
    key = jax.random.PRNGKey(0)
    k_ids, k_par = jax.random.split(key)
    B, S = 2, 8
    input_ids = jax.random.randint(k_ids, (B, S), 0, VOCAB, dtype=jnp.int32)
    params = init_params(k_par)

    out = disaster_tweet_classifier_forward(params, input_ids)
    out = jax.block_until_ready(out)
    assert out.shape == (B, S, HIDDEN) and out.dtype == jnp.float32
    assert bool(jnp.all(jnp.isfinite(out)))
    print("KERNEL_OK")
</pallas_src>

<mosaic_0001>
module attributes {stable_mosaic.version = 11 : i64} {
  func.func @kernel(%arg0: memref<16xi32, #tpu.memory_space<smem>>, %arg1: memref<128x32xf32, #tpu.memory_space<vmem>>, %arg2: memref<64x32xf32, #tpu.memory_space<vmem>>, %arg3: memref<2x32xf32, #tpu.memory_space<vmem>>, %arg4: memref<1x32xf32, #tpu.memory_space<vmem>>, %arg5: memref<1x32xf32, #tpu.memory_space<vmem>>, %arg6: memref<2x32x96xf32, #tpu.memory_space<vmem>>, %arg7: memref<2x1x96xf32, #tpu.memory_space<vmem>>, %arg8: memref<2x32x32xf32, #tpu.memory_space<vmem>>, %arg9: memref<2x1x32xf32, #tpu.memory_space<vmem>>, %arg10: memref<2x1x32xf32, #tpu.memory_space<vmem>>, %arg11: memref<2x1x32xf32, #tpu.memory_space<vmem>>, %arg12: memref<2x32x64xf32, #tpu.memory_space<vmem>>, %arg13: memref<2x1x64xf32, #tpu.memory_space<vmem>>, %arg14: memref<2x64x32xf32, #tpu.memory_space<vmem>>, %arg15: memref<2x1x32xf32, #tpu.memory_space<vmem>>, %arg16: memref<2x1x32xf32, #tpu.memory_space<vmem>>, %arg17: memref<2x1x32xf32, #tpu.memory_space<vmem>>, %arg18: memref<16x32xf32, #tpu.memory_space<vmem>>) attributes {dimension_semantics = [], scalar_prefetch = 0 : i64, scratch_operands = 0 : i64, tpu.core_type = #tpu.core_type<tc>} {
    %c0 = arith.constant 0 : index
    %0 = memref.load %arg0[%c0] : memref<16xi32, #tpu.memory_space<smem>>
    %1 = arith.index_cast %0 : i32 to index
    %c0_0 = arith.constant 0 : index
    %2 = vector.load %arg1[%1, %c0_0] : memref<128x32xf32, #tpu.memory_space<vmem>>, vector<1x32xf32>
    %c1 = arith.constant 1 : index
    %3 = memref.load %arg0[%c1] : memref<16xi32, #tpu.memory_space<smem>>
    %4 = arith.index_cast %3 : i32 to index
    %c0_1 = arith.constant 0 : index
    %5 = vector.load %arg1[%4, %c0_1] : memref<128x32xf32, #tpu.memory_space<vmem>>, vector<1x32xf32>
    %c2 = arith.constant 2 : index
    %6 = memref.load %arg0[%c2] : memref<16xi32, #tpu.memory_space<smem>>
    %7 = arith.index_cast %6 : i32 to index
    %c0_2 = arith.constant 0 : index
    %8 = vector.load %arg1[%7, %c0_2] : memref<128x32xf32, #tpu.memory_space<vmem>>, vector<1x32xf32>
    %c3 = arith.constant 3 : index
    %9 = memref.load %arg0[%c3] : memref<16xi32, #tpu.memory_space<smem>>
    %10 = arith.index_cast %9 : i32 to index
    %c0_3 = arith.constant 0 : index
    %11 = vector.load %arg1[%10, %c0_3] : memref<128x32xf32, #tpu.memory_space<vmem>>, vector<1x32xf32>
    %c4 = arith.constant 4 : index
    %12 = memref.load %arg0[%c4] : memref<16xi32, #tpu.memory_space<smem>>
    %13 = arith.index_cast %12 : i32 to index
    %c0_4 = arith.constant 0 : index
    %14 = vector.load %arg1[%13, %c0_4] : memref<128x32xf32, #tpu.memory_space<vmem>>, vector<1x32xf32>
    %c5 = arith.constant 5 : index
    %15 = memref.load %arg0[%c5] : memref<16xi32, #tpu.memory_space<smem>>
    %16 = arith.index_cast %15 : i32 to index
    %c0_5 = arith.constant 0 : index
    %17 = vector.load %arg1[%16, %c0_5] : memref<128x32xf32, #tpu.memory_space<vmem>>, vector<1x32xf32>
    %c6 = arith.constant 6 : index
    %18 = memref.load %arg0[%c6] : memref<16xi32, #tpu.memory_space<smem>>
    %19 = arith.index_cast %18 : i32 to index
    %c0_6 = arith.constant 0 : index
    %20 = vector.load %arg1[%19, %c0_6] : memref<128x32xf32, #tpu.memory_space<vmem>>, vector<1x32xf32>
    %c7 = arith.constant 7 : index
    %21 = memref.load %arg0[%c7] : memref<16xi32, #tpu.memory_space<smem>>
    %22 = arith.index_cast %21 : i32 to index
    %c0_7 = arith.constant 0 : index
    %23 = vector.load %arg1[%22, %c0_7] : memref<128x32xf32, #tpu.memory_space<vmem>>, vector<1x32xf32>
    %c8 = arith.constant 8 : index
    %24 = memref.load %arg0[%c8] : memref<16xi32, #tpu.memory_space<smem>>
    %25 = arith.index_cast %24 : i32 to index
    %c0_8 = arith.constant 0 : index
    %26 = vector.load %arg1[%25, %c0_8] : memref<128x32xf32, #tpu.memory_space<vmem>>, vector<1x32xf32>
    %c9 = arith.constant 9 : index
    %27 = memref.load %arg0[%c9] : memref<16xi32, #tpu.memory_space<smem>>
    %28 = arith.index_cast %27 : i32 to index
    %c0_9 = arith.constant 0 : index
    %29 = vector.load %arg1[%28, %c0_9] : memref<128x32xf32, #tpu.memory_space<vmem>>, vector<1x32xf32>
    %c10 = arith.constant 10 : index
    %30 = memref.load %arg0[%c10] : memref<16xi32, #tpu.memory_space<smem>>
    %31 = arith.index_cast %30 : i32 to index
    %c0_10 = arith.constant 0 : index
    %32 = vector.load %arg1[%31, %c0_10] : memref<128x32xf32, #tpu.memory_space<vmem>>, vector<1x32xf32>
    %c11 = arith.constant 11 : index
    %33 = memref.load %arg0[%c11] : memref<16xi32, #tpu.memory_space<smem>>
    %34 = arith.index_cast %33 : i32 to index
    %c0_11 = arith.constant 0 : index
    %35 = vector.load %arg1[%34, %c0_11] : memref<128x32xf32, #tpu.memory_space<vmem>>, vector<1x32xf32>
    %c12 = arith.constant 12 : index
    %36 = memref.load %arg0[%c12] : memref<16xi32, #tpu.memory_space<smem>>
    %37 = arith.index_cast %36 : i32 to index
    %c0_12 = arith.constant 0 : index
    %38 = vector.load %arg1[%37, %c0_12] : memref<128x32xf32, #tpu.memory_space<vmem>>, vector<1x32xf32>
    %c13 = arith.constant 13 : index
    %39 = memref.load %arg0[%c13] : memref<16xi32, #tpu.memory_space<smem>>
    %40 = arith.index_cast %39 : i32 to index
    %c0_13 = arith.constant 0 : index
    %41 = vector.load %arg1[%40, %c0_13] : memref<128x32xf32, #tpu.memory_space<vmem>>, vector<1x32xf32>
    %c14 = arith.constant 14 : index
    %42 = memref.load %arg0[%c14] : memref<16xi32, #tpu.memory_space<smem>>
    %43 = arith.index_cast %42 : i32 to index
    %c0_14 = arith.constant 0 : index
    %44 = vector.load %arg1[%43, %c0_14] : memref<128x32xf32, #tpu.memory_space<vmem>>, vector<1x32xf32>
    %c15 = arith.constant 15 : index
    %45 = memref.load %arg0[%c15] : memref<16xi32, #tpu.memory_space<smem>>
    %46 = arith.index_cast %45 : i32 to index
    %c0_15 = arith.constant 0 : index
    %47 = vector.load %arg1[%46, %c0_15] : memref<128x32xf32, #tpu.memory_space<vmem>>, vector<1x32xf32>
    %48 = tpu.concatenate %2, %5, %8, %11, %14, %17, %20, %23, %26, %29, %32, %35, %38, %41, %44, %47 in 0 : vector<1x32xf32>, vector<1x32xf32>, vector<1x32xf32>, vector<1x32xf32>, vector<1x32xf32>, vector<1x32xf32>, vector<1x32xf32>, vector<1x32xf32>, vector<1x32xf32>, vector<1x32xf32>, vector<1x32xf32>, vector<1x32xf32>, vector<1x32xf32>, vector<1x32xf32>, vector<1x32xf32>, vector<1x32xf32> -> vector<16x32xf32>
    %c0_16 = arith.constant 0 : index
    %c0_17 = arith.constant 0 : index
    %49 = vector.load %arg2[%c0_16, %c0_17] : memref<64x32xf32, #tpu.memory_space<vmem>>, vector<8x32xf32>
    %50 = tpu.concatenate %49, %49 in 0 : vector<8x32xf32>, vector<8x32xf32> -> vector<16x32xf32>
    %51 = arith.addf %48, %50 : vector<16x32xf32>
    %c0_18 = arith.constant 0 : index
    %c0_19 = arith.constant 0 : index
    %52 = vector.load %arg3[%c0_18, %c0_19] : memref<2x32xf32, #tpu.memory_space<vmem>>, vector<1x32xf32>
    %53 = vector.broadcast %52 : vector<1x32xf32> to vector<16x32xf32>
    %54 = arith.addf %51, %53 : vector<16x32xf32>
    %c0_20 = arith.constant 0 : index
    %c0_21 = arith.constant 0 : index
    %55 = vector.load %arg4[%c0_20, %c0_21] : memref<1x32xf32, #tpu.memory_space<vmem>>, vector<1x32xf32>
    %c0_22 = arith.constant 0 : index
    %c0_23 = arith.constant 0 : index
    %56 = vector.load %arg5[%c0_22, %c0_23] : memref<1x32xf32, #tpu.memory_space<vmem>>, vector<1x32xf32>
    %cst = arith.constant dense<0.000000e+00> : vector<16xf32>
    %57 = vector.multi_reduction <add>, %54, %cst [1] : vector<16x32xf32> to vector<16xf32>
    %58 = vector.shape_cast %57 : vector<16xf32> to vector<16x1xf32>
    %cst_24 = arith.constant 3.200000e+01 : f32
    %59 = vector.broadcast %cst_24 : f32 to vector<16x1xf32>
    %60 = arith.divf %58, %59 : vector<16x1xf32>
    %61 = vector.broadcast %60 : vector<16x1xf32> to vector<16x32xf32>
    %62 = arith.subf %54, %61 : vector<16x32xf32>
    %63 = arith.mulf %62, %62 : vector<16x32xf32>
    %cst_25 = arith.constant dense<0.000000e+00> : vector<16xf32>
    %64 = vector.multi_reduction <add>, %63, %cst_25 [1] : vector<16x32xf32> to vector<16xf32>
    %65 = vector.shape_cast %64 : vector<16xf32> to vector<16x1xf32>
    %cst_26 = arith.constant 3.200000e+01 : f32
    %66 = vector.broadcast %cst_26 : f32 to vector<16x1xf32>
    %67 = arith.divf %65, %66 : vector<16x1xf32>
    %68 = vector.broadcast %60 : vector<16x1xf32> to vector<16x32xf32>
    %69 = arith.subf %54, %68 : vector<16x32xf32>
    %cst_27 = arith.constant 9.99999996E-13 : f32
    %70 = vector.broadcast %cst_27 : f32 to vector<16x1xf32>
    %71 = arith.addf %67, %70 : vector<16x1xf32>
    %72 = math.rsqrt %71 : vector<16x1xf32>
    %73 = vector.broadcast %72 : vector<16x1xf32> to vector<16x32xf32>
    %74 = arith.mulf %69, %73 : vector<16x32xf32>
    %75 = vector.broadcast %55 : vector<1x32xf32> to vector<16x32xf32>
    %76 = arith.mulf %74, %75 : vector<16x32xf32>
    %77 = vector.broadcast %56 : vector<1x32xf32> to vector<16x32xf32>
    %78 = arith.addf %76, %77 : vector<16x32xf32>
    %c0_28 = arith.constant 0 : index
    %c0_29 = arith.constant 0 : index
    %c0_30 = arith.constant 0 : index
    %79 = vector.load %arg6[%c0_28, %c0_29, %c0_30] : memref<2x32x96xf32, #tpu.memory_space<vmem>>, vector<1x32x96xf32>
    %80 = vector.shape_cast %79 : vector<1x32x96xf32> to vector<32x96xf32>
    %c0_31 = arith.constant 0 : index
    %c0_32 = arith.constant 0 : index
    %c0_33 = arith.constant 0 : index
    %81 = vector.load %arg7[%c0_31, %c0_32, %c0_33] : memref<2x1x96xf32, #tpu.memory_space<vmem>>, vector<1x1x96xf32>
    %82 = vector.shape_cast %81 : vector<1x1x96xf32> to vector<1x96xf32>
    %c0_34 = arith.constant 0 : index
    %c0_35 = arith.constant 0 : index
    %c0_36 = arith.constant 0 : index
    %83 = vector.load %arg8[%c0_34, %c0_35, %c0_36] : memref<2x32x32xf32, #tpu.memory_space<vmem>>, vector<1x32x32xf32>
    %84 = vector.shape_cast %83 : vector<1x32x32xf32> to vector<32x32xf32>
    %c0_37 = arith.constant 0 : index
    %c0_38 = arith.constant 0 : index
    %c0_39 = arith.constant 0 : index
    %85 = vector.load %arg9[%c0_37, %c0_38, %c0_39] : memref<2x1x32xf32, #tpu.memory_space<vmem>>, vector<1x1x32xf32>
    %86 = vector.shape_cast %85 : vector<1x1x32xf32> to vector<1x32xf32>
    %c0_40 = arith.constant 0 : index
    %c0_41 = arith.constant 0 : index
    %c0_42 = arith.constant 0 : index
    %87 = vector.load %arg10[%c0_40, %c0_41, %c0_42] : memref<2x1x32xf32, #tpu.memory_space<vmem>>, vector<1x1x32xf32>
    %88 = vector.shape_cast %87 : vector<1x1x32xf32> to vector<1x32xf32>
    %c0_43 = arith.constant 0 : index
    %c0_44 = arith.constant 0 : index
    %c0_45 = arith.constant 0 : index
    %89 = vector.load %arg11[%c0_43, %c0_44, %c0_45] : memref<2x1x32xf32, #tpu.memory_space<vmem>>, vector<1x1x32xf32>
    %90 = vector.shape_cast %89 : vector<1x1x32xf32> to vector<1x32xf32>
    %c0_46 = arith.constant 0 : index
    %c0_47 = arith.constant 0 : index
    %c0_48 = arith.constant 0 : index
    %91 = vector.load %arg12[%c0_46, %c0_47, %c0_48] : memref<2x32x64xf32, #tpu.memory_space<vmem>>, vector<1x32x64xf32>
    %92 = vector.shape_cast %91 : vector<1x32x64xf32> to vector<32x64xf32>
    %c0_49 = arith.constant 0 : index
    %c0_50 = arith.constant 0 : index
    %c0_51 = arith.constant 0 : index
    %93 = vector.load %arg13[%c0_49, %c0_50, %c0_51] : memref<2x1x64xf32, #tpu.memory_space<vmem>>, vector<1x1x64xf32>
    %94 = vector.shape_cast %93 : vector<1x1x64xf32> to vector<1x64xf32>
    %c0_52 = arith.constant 0 : index
    %c0_53 = arith.constant 0 : index
    %c0_54 = arith.constant 0 : index
    %95 = vector.load %arg14[%c0_52, %c0_53, %c0_54] : memref<2x64x32xf32, #tpu.memory_space<vmem>>, vector<1x64x32xf32>
    %96 = vector.shape_cast %95 : vector<1x64x32xf32> to vector<64x32xf32>
    %c0_55 = arith.constant 0 : index
    %c0_56 = arith.constant 0 : index
    %c0_57 = arith.constant 0 : index
    %97 = vector.load %arg15[%c0_55, %c0_56, %c0_57] : memref<2x1x32xf32, #tpu.memory_space<vmem>>, vector<1x1x32xf32>
    %98 = vector.shape_cast %97 : vector<1x1x32xf32> to vector<1x32xf32>
    %c0_58 = arith.constant 0 : index
    %c0_59 = arith.constant 0 : index
    %c0_60 = arith.constant 0 : index
    %99 = vector.load %arg16[%c0_58, %c0_59, %c0_60] : memref<2x1x32xf32, #tpu.memory_space<vmem>>, vector<1x1x32xf32>
    %100 = vector.shape_cast %99 : vector<1x1x32xf32> to vector<1x32xf32>
    %c0_61 = arith.constant 0 : index
    %c0_62 = arith.constant 0 : index
    %c0_63 = arith.constant 0 : index
    %101 = vector.load %arg17[%c0_61, %c0_62, %c0_63] : memref<2x1x32xf32, #tpu.memory_space<vmem>>, vector<1x1x32xf32>
    %102 = vector.shape_cast %101 : vector<1x1x32xf32> to vector<1x32xf32>
    %cst_64 = arith.constant dense<0.000000e+00> : vector<16x96xf32>
    %103 = tpu.matmul %78, %80, %cst_64 {dimension_numbers = #tpu.dot_dimension_numbers<[1], [0], [0], [1], [0, 0, 1, 1], [], []>} : vector<16x32xf32>, vector<32x96xf32>, vector<16x96xf32> -> vector<16x96xf32>
    %104 = vector.broadcast %82 : vector<1x96xf32> to vector<16x96xf32>
    %105 = arith.addf %103, %104 : vector<16x96xf32>
    %106 = vector.extract_strided_slice %105 {offsets = [0, 0], sizes = [8, 16], strides = [1, 1]} : vector<16x96xf32> to vector<8x16xf32>
    %107 = vector.extract_strided_slice %105 {offsets = [0, 16], sizes = [8, 16], strides = [1, 1]} : vector<16x96xf32> to vector<8x16xf32>
    %108 = vector.extract_strided_slice %105 {offsets = [8, 0], sizes = [8, 16], strides = [1, 1]} : vector<16x96xf32> to vector<8x16xf32>
    %109 = vector.extract_strided_slice %105 {offsets = [8, 16], sizes = [8, 16], strides = [1, 1]} : vector<16x96xf32> to vector<8x16xf32>
    %110 = vector.shape_cast %106 : vector<8x16xf32> to vector<1x8x16xf32>
    %111 = vector.shape_cast %107 : vector<8x16xf32> to vector<1x8x16xf32>
    %112 = vector.shape_cast %108 : vector<8x16xf32> to vector<1x8x16xf32>
    %113 = vector.shape_cast %109 : vector<8x16xf32> to vector<1x8x16xf32>
    %114 = tpu.concatenate %110, %111, %112, %113 in 0 : vector<1x8x16xf32>, vector<1x8x16xf32>, vector<1x8x16xf32>, vector<1x8x16xf32> -> vector<4x8x16xf32>
    %115 = vector.extract_strided_slice %105 {offsets = [0, 32], sizes = [8, 16], strides = [1, 1]} : vector<16x96xf32> to vector<8x16xf32>
    %116 = vector.extract_strided_slice %105 {offsets = [0, 48], sizes = [8, 16], strides = [1, 1]} : vector<16x96xf32> to vector<8x16xf32>
    %117 = vector.extract_strided_slice %105 {offsets = [8, 32], sizes = [8, 16], strides = [1, 1]} : vector<16x96xf32> to vector<8x16xf32>
    %118 = vector.extract_strided_slice %105 {offsets = [8, 48], sizes = [8, 16], strides = [1, 1]} : vector<16x96xf32> to vector<8x16xf32>
    %119 = vector.shape_cast %115 : vector<8x16xf32> to vector<1x8x16xf32>
    %120 = vector.shape_cast %116 : vector<8x16xf32> to vector<1x8x16xf32>
    %121 = vector.shape_cast %117 : vector<8x16xf32> to vector<1x8x16xf32>
    %122 = vector.shape_cast %118 : vector<8x16xf32> to vector<1x8x16xf32>
    %123 = tpu.concatenate %119, %120, %121, %122 in 0 : vector<1x8x16xf32>, vector<1x8x16xf32>, vector<1x8x16xf32>, vector<1x8x16xf32> -> vector<4x8x16xf32>
    %124 = vector.extract_strided_slice %105 {offsets = [0, 64], sizes = [8, 16], strides = [1, 1]} : vector<16x96xf32> to vector<8x16xf32>
    %125 = vector.extract_strided_slice %105 {offsets = [0, 80], sizes = [8, 16], strides = [1, 1]} : vector<16x96xf32> to vector<8x16xf32>
    %126 = vector.extract_strided_slice %105 {offsets = [8, 64], sizes = [8, 16], strides = [1, 1]} : vector<16x96xf32> to vector<8x16xf32>
    %127 = vector.extract_strided_slice %105 {offsets = [8, 80], sizes = [8, 16], strides = [1, 1]} : vector<16x96xf32> to vector<8x16xf32>
    %128 = vector.shape_cast %124 : vector<8x16xf32> to vector<1x8x16xf32>
    %129 = vector.shape_cast %125 : vector<8x16xf32> to vector<1x8x16xf32>
    %130 = vector.shape_cast %126 : vector<8x16xf32> to vector<1x8x16xf32>
    %131 = vector.shape_cast %127 : vector<8x16xf32> to vector<1x8x16xf32>
    %132 = tpu.concatenate %128, %129, %130, %131 in 0 : vector<1x8x16xf32>, vector<1x8x16xf32>, vector<1x8x16xf32>, vector<1x8x16xf32> -> vector<4x8x16xf32>
    "tpu.trace_start"() <{level = 10 : i32, message = "bqd,bkd->bqk"}> : () -> ()
    %cst_65 = arith.constant dense<0.000000e+00> : vector<4x8x8xf32>
    %133 = tpu.matmul %114, %123, %cst_65 {dimension_numbers = #tpu.dot_dimension_numbers<[2], [2], [1], [1], [0, 0, 0, 1, 1, 1], [0], [0]>} : vector<4x8x16xf32>, vector<4x8x16xf32>, vector<4x8x8xf32> -> vector<4x8x8xf32>
    "tpu.trace_stop"() : () -> ()
    %cst_66 = arith.constant 2.500000e-01 : f32
    %134 = vector.broadcast %cst_66 : f32 to vector<4x8x8xf32>
    %135 = arith.mulf %133, %134 : vector<4x8x8xf32>
    %cst_67 = arith.constant dense<0xFF800000> : vector<4x8xf32>
    %136 = vector.multi_reduction <maximumf>, %135, %cst_67 [2] : vector<4x8x8xf32> to vector<4x8xf32>
    %137 = vector.shape_cast %136 : vector<4x8xf32> to vector<4x8x1xf32>
    %138 = vector.broadcast %137 : vector<4x8x1xf32> to vector<4x8x8xf32>
    %139 = arith.subf %135, %138 : vector<4x8x8xf32>
    %140 = math.exp %139 : vector<4x8x8xf32>
    %cst_68 = arith.constant dense<0.000000e+00> : vector<4x8xf32>
    %141 = vector.multi_reduction <add>, %140, %cst_68 [2] : vector<4x8x8xf32> to vector<4x8xf32>
    %142 = vector.shape_cast %141 : vector<4x8xf32> to vector<4x8x1xf32>
    %143 = tpu.reciprocal %142 {approx = true} : vector<4x8x1xf32> -> vector<4x8x1xf32>
    %144 = vector.broadcast %143 : vector<4x8x1xf32> to vector<4x8x8xf32>
    %145 = arith.mulf %140, %144 : vector<4x8x8xf32>
    "tpu.trace_start"() <{level = 10 : i32, message = "bqk,bkd->bqd"}> : () -> ()
    %cst_69 = arith.constant dense<0.000000e+00> : vector<4x8x16xf32>
    %146 = tpu.matmul %145, %132, %cst_69 {dimension_numbers = #tpu.dot_dimension_numbers<[2], [1], [1], [2], [0, 0, 0, 1, 1, 2], [0], [0]>} : vector<4x8x8xf32>, vector<4x8x16xf32>, vector<4x8x16xf32> -> vector<4x8x16xf32>
    "tpu.trace_stop"() : () -> ()
    %147 = vector.extract_strided_slice %146 {offsets = [0, 0, 0], sizes = [1, 8, 16], strides = [1, 1, 1]} : vector<4x8x16xf32> to vector<1x8x16xf32>
    %148 = vector.shape_cast %147 : vector<1x8x16xf32> to vector<8x16xf32>
    %149 = vector.extract_strided_slice %146 {offsets = [1, 0, 0], sizes = [1, 8, 16], strides = [1, 1, 1]} : vector<4x8x16xf32> to vector<1x8x16xf32>
    %150 = vector.shape_cast %149 : vector<1x8x16xf32> to vector<8x16xf32>
    %151 = tpu.concatenate %148, %150 in 1 : vector<8x16xf32>, vector<8x16xf32> -> vector<8x32xf32>
    %152 = vector.extract_strided_slice %146 {offsets = [2, 0, 0], sizes = [1, 8, 16], strides = [1, 1, 1]} : vector<4x8x16xf32> to vector<1x8x16xf32>
    %153 = vector.shape_cast %152 : vector<1x8x16xf32> to vector<8x16xf32>
    %154 = vector.extract_strided_slice %146 {offsets = [3, 0, 0], sizes = [1, 8, 16], strides = [1, 1, 1]} : vector<4x8x16xf32> to vector<1x8x16xf32>
    %155 = vector.shape_cast %154 : vector<1x8x16xf32> to vector<8x16xf32>
    %156 = tpu.concatenate %153, %155 in 1 : vector<8x16xf32>, vector<8x16xf32> -> vector<8x32xf32>
    %157 = tpu.concatenate %151, %156 in 0 : vector<8x32xf32>, vector<8x32xf32> -> vector<16x32xf32>
    %cst_70 = arith.constant dense<0.000000e+00> : vector<16x32xf32>
    %158 = tpu.matmul %157, %84, %cst_70 {dimension_numbers = #tpu.dot_dimension_numbers<[1], [0], [0], [1], [0, 0, 1, 1], [], []>} : vector<16x32xf32>, vector<32x32xf32>, vector<16x32xf32> -> vector<16x32xf32>
    %159 = vector.broadcast %86 : vector<1x32xf32> to vector<16x32xf32>
    %160 = arith.addf %158, %159 : vector<16x32xf32>
    %161 = arith.addf %78, %160 : vector<16x32xf32>
    %cst_71 = arith.constant dense<0.000000e+00> : vector<16xf32>
    %162 = vector.multi_reduction <add>, %161, %cst_71 [1] : vector<16x32xf32> to vector<16xf32>
    %163 = vector.shape_cast %162 : vector<16xf32> to vector<16x1xf32>
    %cst_72 = arith.constant 3.200000e+01 : f32
    %164 = vector.broadcast %cst_72 : f32 to vector<16x1xf32>
    %165 = arith.divf %163, %164 : vector<16x1xf32>
    %166 = vector.broadcast %165 : vector<16x1xf32> to vector<16x32xf32>
    %167 = arith.subf %161, %166 : vector<16x32xf32>
    %168 = arith.mulf %167, %167 : vector<16x32xf32>
    %cst_73 = arith.constant dense<0.000000e+00> : vector<16xf32>
    %169 = vector.multi_reduction <add>, %168, %cst_73 [1] : vector<16x32xf32> to vector<16xf32>
    %170 = vector.shape_cast %169 : vector<16xf32> to vector<16x1xf32>
    %cst_74 = arith.constant 3.200000e+01 : f32
    %171 = vector.broadcast %cst_74 : f32 to vector<16x1xf32>
    %172 = arith.divf %170, %171 : vector<16x1xf32>
    %173 = vector.broadcast %165 : vector<16x1xf32> to vector<16x32xf32>
    %174 = arith.subf %161, %173 : vector<16x32xf32>
    %cst_75 = arith.constant 9.99999996E-13 : f32
    %175 = vector.broadcast %cst_75 : f32 to vector<16x1xf32>
    %176 = arith.addf %172, %175 : vector<16x1xf32>
    %177 = math.rsqrt %176 : vector<16x1xf32>
    %178 = vector.broadcast %177 : vector<16x1xf32> to vector<16x32xf32>
    %179 = arith.mulf %174, %178 : vector<16x32xf32>
    %180 = vector.broadcast %88 : vector<1x32xf32> to vector<16x32xf32>
    %181 = arith.mulf %179, %180 : vector<16x32xf32>
    %182 = vector.broadcast %90 : vector<1x32xf32> to vector<16x32xf32>
    %183 = arith.addf %181, %182 : vector<16x32xf32>
    %cst_76 = arith.constant dense<0.000000e+00> : vector<16x64xf32>
    %184 = tpu.matmul %183, %92, %cst_76 {dimension_numbers = #tpu.dot_dimension_numbers<[1], [0], [0], [1], [0, 0, 1, 1], [], []>} : vector<16x32xf32>, vector<32x64xf32>, vector<16x64xf32> -> vector<16x64xf32>
    %185 = vector.broadcast %94 : vector<1x64xf32> to vector<16x64xf32>
    %186 = arith.addf %184, %185 : vector<16x64xf32>
    %187 = arith.mulf %186, %186 : vector<16x64xf32>
    %188 = arith.mulf %186, %187 : vector<16x64xf32>
    %cst_77 = arith.constant 4.471500e-02 : f32
    %189 = vector.broadcast %cst_77 : f32 to vector<16x64xf32>
    %190 = arith.mulf %189, %188 : vector<16x64xf32>
    %191 = arith.addf %186, %190 : vector<16x64xf32>
    %cst_78 = arith.constant 0.797884583 : f32
    %192 = vector.broadcast %cst_78 : f32 to vector<16x64xf32>
    %193 = arith.mulf %192, %191 : vector<16x64xf32>
    %194 = math.tanh %193 : vector<16x64xf32>
    %cst_79 = arith.constant 1.000000e+00 : f32
    %195 = vector.broadcast %cst_79 : f32 to vector<16x64xf32>
    %196 = arith.addf %195, %194 : vector<16x64xf32>
    %cst_80 = arith.constant 5.000000e-01 : f32
    %197 = vector.broadcast %cst_80 : f32 to vector<16x64xf32>
    %198 = arith.mulf %197, %196 : vector<16x64xf32>
    %199 = arith.mulf %186, %198 : vector<16x64xf32>
    %cst_81 = arith.constant dense<0.000000e+00> : vector<16x32xf32>
    %200 = tpu.matmul %199, %96, %cst_81 {dimension_numbers = #tpu.dot_dimension_numbers<[1], [0], [0], [1], [0, 0, 1, 1], [], []>} : vector<16x64xf32>, vector<64x32xf32>, vector<16x32xf32> -> vector<16x32xf32>
    %201 = vector.broadcast %98 : vector<1x32xf32> to vector<16x32xf32>
    %202 = arith.addf %200, %201 : vector<16x32xf32>
    %203 = arith.addf %183, %202 : vector<16x32xf32>
    %cst_82 = arith.constant dense<0.000000e+00> : vector<16xf32>
    %204 = vector.multi_reduction <add>, %203, %cst_82 [1] : vector<16x32xf32> to vector<16xf32>
    %205 = vector.shape_cast %204 : vector<16xf32> to vector<16x1xf32>
    %cst_83 = arith.constant 3.200000e+01 : f32
    %206 = vector.broadcast %cst_83 : f32 to vector<16x1xf32>
    %207 = arith.divf %205, %206 : vector<16x1xf32>
    %208 = vector.broadcast %207 : vector<16x1xf32> to vector<16x32xf32>
    %209 = arith.subf %203, %208 : vector<16x32xf32>
    %210 = arith.mulf %209, %209 : vector<16x32xf32>
    %cst_84 = arith.constant dense<0.000000e+00> : vector<16xf32>
    %211 = vector.multi_reduction <add>, %210, %cst_84 [1] : vector<16x32xf32> to vector<16xf32>
    %212 = vector.shape_cast %211 : vector<16xf32> to vector<16x1xf32>
    %cst_85 = arith.constant 3.200000e+01 : f32
    %213 = vector.broadcast %cst_85 : f32 to vector<16x1xf32>
    %214 = arith.divf %212, %213 : vector<16x1xf32>
    %215 = vector.broadcast %207 : vector<16x1xf32> to vector<16x32xf32>
    %216 = arith.subf %203, %215 : vector<16x32xf32>
    %cst_86 = arith.constant 9.99999996E-13 : f32
    %217 = vector.broadcast %cst_86 : f32 to vector<16x1xf32>
    %218 = arith.addf %214, %217 : vector<16x1xf32>
    %219 = math.rsqrt %218 : vector<16x1xf32>
    %220 = vector.broadcast %219 : vector<16x1xf32> to vector<16x32xf32>
    %221 = arith.mulf %216, %220 : vector<16x32xf32>
    %222 = vector.broadcast %100 : vector<1x32xf32> to vector<16x32xf32>
    %223 = arith.mulf %221, %222 : vector<16x32xf32>
    %224 = vector.broadcast %102 : vector<1x32xf32> to vector<16x32xf32>
    %225 = arith.addf %223, %224 : vector<16x32xf32>
    %c1_87 = arith.constant 1 : index
    %c0_88 = arith.constant 0 : index
    %c0_89 = arith.constant 0 : index
    %226 = vector.load %arg6[%c1_87, %c0_88, %c0_89] : memref<2x32x96xf32, #tpu.memory_space<vmem>>, vector<1x32x96xf32>
    %227 = vector.shape_cast %226 : vector<1x32x96xf32> to vector<32x96xf32>
    %c1_90 = arith.constant 1 : index
    %c0_91 = arith.constant 0 : index
    %c0_92 = arith.constant 0 : index
    %228 = vector.load %arg7[%c1_90, %c0_91, %c0_92] : memref<2x1x96xf32, #tpu.memory_space<vmem>>, vector<1x1x96xf32>
    %229 = vector.shape_cast %228 : vector<1x1x96xf32> to vector<1x96xf32>
    %c1_93 = arith.constant 1 : index
    %c0_94 = arith.constant 0 : index
    %c0_95 = arith.constant 0 : index
    %230 = vector.load %arg8[%c1_93, %c0_94, %c0_95] : memref<2x32x32xf32, #tpu.memory_space<vmem>>, vector<1x32x32xf32>
    %231 = vector.shape_cast %230 : vector<1x32x32xf32> to vector<32x32xf32>
    %c1_96 = arith.constant 1 : index
    %c0_97 = arith.constant 0 : index
    %c0_98 = arith.constant 0 : index
    %232 = vector.load %arg9[%c1_96, %c0_97, %c0_98] : memref<2x1x32xf32, #tpu.memory_space<vmem>>, vector<1x1x32xf32>
    %233 = vector.shape_cast %232 : vector<1x1x32xf32> to vector<1x32xf32>
    %c1_99 = arith.constant 1 : index
    %c0_100 = arith.constant 0 : index
    %c0_101 = arith.constant 0 : index
    %234 = vector.load %arg10[%c1_99, %c0_100, %c0_101] : memref<2x1x32xf32, #tpu.memory_space<vmem>>, vector<1x1x32xf32>
    %235 = vector.shape_cast %234 : vector<1x1x32xf32> to vector<1x32xf32>
    %c1_102 = arith.constant 1 : index
    %c0_103 = arith.constant 0 : index
    %c0_104 = arith.constant 0 : index
    %236 = vector.load %arg11[%c1_102, %c0_103, %c0_104] : memref<2x1x32xf32, #tpu.memory_space<vmem>>, vector<1x1x32xf32>
    %237 = vector.shape_cast %236 : vector<1x1x32xf32> to vector<1x32xf32>
    %c1_105 = arith.constant 1 : index
    %c0_106 = arith.constant 0 : index
    %c0_107 = arith.constant 0 : index
    %238 = vector.load %arg12[%c1_105, %c0_106, %c0_107] : memref<2x32x64xf32, #tpu.memory_space<vmem>>, vector<1x32x64xf32>
    %239 = vector.shape_cast %238 : vector<1x32x64xf32> to vector<32x64xf32>
    %c1_108 = arith.constant 1 : index
    %c0_109 = arith.constant 0 : index
    %c0_110 = arith.constant 0 : index
    %240 = vector.load %arg13[%c1_108, %c0_109, %c0_110] : memref<2x1x64xf32, #tpu.memory_space<vmem>>, vector<1x1x64xf32>
    %241 = vector.shape_cast %240 : vector<1x1x64xf32> to vector<1x64xf32>
    %c1_111 = arith.constant 1 : index
    %c0_112 = arith.constant 0 : index
    %c0_113 = arith.constant 0 : index
    %242 = vector.load %arg14[%c1_111, %c0_112, %c0_113] : memref<2x64x32xf32, #tpu.memory_space<vmem>>, vector<1x64x32xf32>
    %243 = vector.shape_cast %242 : vector<1x64x32xf32> to vector<64x32xf32>
    %c1_114 = arith.constant 1 : index
    %c0_115 = arith.constant 0 : index
    %c0_116 = arith.constant 0 : index
    %244 = vector.load %arg15[%c1_114, %c0_115, %c0_116] : memref<2x1x32xf32, #tpu.memory_space<vmem>>, vector<1x1x32xf32>
    %245 = vector.shape_cast %244 : vector<1x1x32xf32> to vector<1x32xf32>
    %c1_117 = arith.constant 1 : index
    %c0_118 = arith.constant 0 : index
    %c0_119 = arith.constant 0 : index
    %246 = vector.load %arg16[%c1_117, %c0_118, %c0_119] : memref<2x1x32xf32, #tpu.memory_space<vmem>>, vector<1x1x32xf32>
    %247 = vector.shape_cast %246 : vector<1x1x32xf32> to vector<1x32xf32>
    %c1_120 = arith.constant 1 : index
    %c0_121 = arith.constant 0 : index
    %c0_122 = arith.constant 0 : index
    %248 = vector.load %arg17[%c1_120, %c0_121, %c0_122] : memref<2x1x32xf32, #tpu.memory_space<vmem>>, vector<1x1x32xf32>
    %249 = vector.shape_cast %248 : vector<1x1x32xf32> to vector<1x32xf32>
    %cst_123 = arith.constant dense<0.000000e+00> : vector<16x96xf32>
    %250 = tpu.matmul %225, %227, %cst_123 {dimension_numbers = #tpu.dot_dimension_numbers<[1], [0], [0], [1], [0, 0, 1, 1], [], []>} : vector<16x32xf32>, vector<32x96xf32>, vector<16x96xf32> -> vector<16x96xf32>
    %251 = vector.broadcast %229 : vector<1x96xf32> to vector<16x96xf32>
    %252 = arith.addf %250, %251 : vector<16x96xf32>
    %253 = vector.extract_strided_slice %252 {offsets = [0, 0], sizes = [8, 16], strides = [1, 1]} : vector<16x96xf32> to vector<8x16xf32>
    %254 = vector.extract_strided_slice %252 {offsets = [0, 16], sizes = [8, 16], strides = [1, 1]} : vector<16x96xf32> to vector<8x16xf32>
    %255 = vector.extract_strided_slice %252 {offsets = [8, 0], sizes = [8, 16], strides = [1, 1]} : vector<16x96xf32> to vector<8x16xf32>
    %256 = vector.extract_strided_slice %252 {offsets = [8, 16], sizes = [8, 16], strides = [1, 1]} : vector<16x96xf32> to vector<8x16xf32>
    %257 = vector.shape_cast %253 : vector<8x16xf32> to vector<1x8x16xf32>
    %258 = vector.shape_cast %254 : vector<8x16xf32> to vector<1x8x16xf32>
    %259 = vector.shape_cast %255 : vector<8x16xf32> to vector<1x8x16xf32>
    %260 = vector.shape_cast %256 : vector<8x16xf32> to vector<1x8x16xf32>
    %261 = tpu.concatenate %257, %258, %259, %260 in 0 : vector<1x8x16xf32>, vector<1x8x16xf32>, vector<1x8x16xf32>, vector<1x8x16xf32> -> vector<4x8x16xf32>
    %262 = vector.extract_strided_slice %252 {offsets = [0, 32], sizes = [8, 16], strides = [1, 1]} : vector<16x96xf32> to vector<8x16xf32>
    %263 = vector.extract_strided_slice %252 {offsets = [0, 48], sizes = [8, 16], strides = [1, 1]} : vector<16x96xf32> to vector<8x16xf32>
    %264 = vector.extract_strided_slice %252 {offsets = [8, 32], sizes = [8, 16], strides = [1, 1]} : vector<16x96xf32> to vector<8x16xf32>
    %265 = vector.extract_strided_slice %252 {offsets = [8, 48], sizes = [8, 16], strides = [1, 1]} : vector<16x96xf32> to vector<8x16xf32>
    %266 = vector.shape_cast %262 : vector<8x16xf32> to vector<1x8x16xf32>
    %267 = vector.shape_cast %263 : vector<8x16xf32> to vector<1x8x16xf32>
    %268 = vector.shape_cast %264 : vector<8x16xf32> to vector<1x8x16xf32>
    %269 = vector.shape_cast %265 : vector<8x16xf32> to vector<1x8x16xf32>
    %270 = tpu.concatenate %266, %267, %268, %269 in 0 : vector<1x8x16xf32>, vector<1x8x16xf32>, vector<1x8x16xf32>, vector<1x8x16xf32> -> vector<4x8x16xf32>
    %271 = vector.extract_strided_slice %252 {offsets = [0, 64], sizes = [8, 16], strides = [1, 1]} : vector<16x96xf32> to vector<8x16xf32>
    %272 = vector.extract_strided_slice %252 {offsets = [0, 80], sizes = [8, 16], strides = [1, 1]} : vector<16x96xf32> to vector<8x16xf32>
    %273 = vector.extract_strided_slice %252 {offsets = [8, 64], sizes = [8, 16], strides = [1, 1]} : vector<16x96xf32> to vector<8x16xf32>
    %274 = vector.extract_strided_slice %252 {offsets = [8, 80], sizes = [8, 16], strides = [1, 1]} : vector<16x96xf32> to vector<8x16xf32>
    %275 = vector.shape_cast %271 : vector<8x16xf32> to vector<1x8x16xf32>
    %276 = vector.shape_cast %272 : vector<8x16xf32> to vector<1x8x16xf32>
    %277 = vector.shape_cast %273 : vector<8x16xf32> to vector<1x8x16xf32>
    %278 = vector.shape_cast %274 : vector<8x16xf32> to vector<1x8x16xf32>
    %279 = tpu.concatenate %275, %276, %277, %278 in 0 : vector<1x8x16xf32>, vector<1x8x16xf32>, vector<1x8x16xf32>, vector<1x8x16xf32> -> vector<4x8x16xf32>
    "tpu.trace_start"() <{level = 10 : i32, message = "bqd,bkd->bqk"}> : () -> ()
    %cst_124 = arith.constant dense<0.000000e+00> : vector<4x8x8xf32>
    %280 = tpu.matmul %261, %270, %cst_124 {dimension_numbers = #tpu.dot_dimension_numbers<[2], [2], [1], [1], [0, 0, 0, 1, 1, 1], [0], [0]>} : vector<4x8x16xf32>, vector<4x8x16xf32>, vector<4x8x8xf32> -> vector<4x8x8xf32>
    "tpu.trace_stop"() : () -> ()
    %cst_125 = arith.constant 2.500000e-01 : f32
    %281 = vector.broadcast %cst_125 : f32 to vector<4x8x8xf32>
    %282 = arith.mulf %280, %281 : vector<4x8x8xf32>
    %cst_126 = arith.constant dense<0xFF800000> : vector<4x8xf32>
    %283 = vector.multi_reduction <maximumf>, %282, %cst_126 [2] : vector<4x8x8xf32> to vector<4x8xf32>
    %284 = vector.shape_cast %283 : vector<4x8xf32> to vector<4x8x1xf32>
    %285 = vector.broadcast %284 : vector<4x8x1xf32> to vector<4x8x8xf32>
    %286 = arith.subf %282, %285 : vector<4x8x8xf32>
    %287 = math.exp %286 : vector<4x8x8xf32>
    %cst_127 = arith.constant dense<0.000000e+00> : vector<4x8xf32>
    %288 = vector.multi_reduction <add>, %287, %cst_127 [2] : vector<4x8x8xf32> to vector<4x8xf32>
    %289 = vector.shape_cast %288 : vector<4x8xf32> to vector<4x8x1xf32>
    %290 = tpu.reciprocal %289 {approx = true} : vector<4x8x1xf32> -> vector<4x8x1xf32>
    %291 = vector.broadcast %290 : vector<4x8x1xf32> to vector<4x8x8xf32>
    %292 = arith.mulf %287, %291 : vector<4x8x8xf32>
    "tpu.trace_start"() <{level = 10 : i32, message = "bqk,bkd->bqd"}> : () -> ()
    %cst_128 = arith.constant dense<0.000000e+00> : vector<4x8x16xf32>
    %293 = tpu.matmul %292, %279, %cst_128 {dimension_numbers = #tpu.dot_dimension_numbers<[2], [1], [1], [2], [0, 0, 0, 1, 1, 2], [0], [0]>} : vector<4x8x8xf32>, vector<4x8x16xf32>, vector<4x8x16xf32> -> vector<4x8x16xf32>
    "tpu.trace_stop"() : () -> ()
    %294 = vector.extract_strided_slice %293 {offsets = [0, 0, 0], sizes = [1, 8, 16], strides = [1, 1, 1]} : vector<4x8x16xf32> to vector<1x8x16xf32>
    %295 = vector.shape_cast %294 : vector<1x8x16xf32> to vector<8x16xf32>
    %296 = vector.extract_strided_slice %293 {offsets = [1, 0, 0], sizes = [1, 8, 16], strides = [1, 1, 1]} : vector<4x8x16xf32> to vector<1x8x16xf32>
    %297 = vector.shape_cast %296 : vector<1x8x16xf32> to vector<8x16xf32>
    %298 = tpu.concatenate %295, %297 in 1 : vector<8x16xf32>, vector<8x16xf32> -> vector<8x32xf32>
    %299 = vector.extract_strided_slice %293 {offsets = [2, 0, 0], sizes = [1, 8, 16], strides = [1, 1, 1]} : vector<4x8x16xf32> to vector<1x8x16xf32>
    %300 = vector.shape_cast %299 : vector<1x8x16xf32> to vector<8x16xf32>
    %301 = vector.extract_strided_slice %293 {offsets = [3, 0, 0], sizes = [1, 8, 16], strides = [1, 1, 1]} : vector<4x8x16xf32> to vector<1x8x16xf32>
    %302 = vector.shape_cast %301 : vector<1x8x16xf32> to vector<8x16xf32>
    %303 = tpu.concatenate %300, %302 in 1 : vector<8x16xf32>, vector<8x16xf32> -> vector<8x32xf32>
    %304 = tpu.concatenate %298, %303 in 0 : vector<8x32xf32>, vector<8x32xf32> -> vector<16x32xf32>
    %cst_129 = arith.constant dense<0.000000e+00> : vector<16x32xf32>
    %305 = tpu.matmul %304, %231, %cst_129 {dimension_numbers = #tpu.dot_dimension_numbers<[1], [0], [0], [1], [0, 0, 1, 1], [], []>} : vector<16x32xf32>, vector<32x32xf32>, vector<16x32xf32> -> vector<16x32xf32>
    %306 = vector.broadcast %233 : vector<1x32xf32> to vector<16x32xf32>
    %307 = arith.addf %305, %306 : vector<16x32xf32>
    %308 = arith.addf %225, %307 : vector<16x32xf32>
    %cst_130 = arith.constant dense<0.000000e+00> : vector<16xf32>
    %309 = vector.multi_reduction <add>, %308, %cst_130 [1] : vector<16x32xf32> to vector<16xf32>
    %310 = vector.shape_cast %309 : vector<16xf32> to vector<16x1xf32>
    %cst_131 = arith.constant 3.200000e+01 : f32
    %311 = vector.broadcast %cst_131 : f32 to vector<16x1xf32>
    %312 = arith.divf %310, %311 : vector<16x1xf32>
    %313 = vector.broadcast %312 : vector<16x1xf32> to vector<16x32xf32>
    %314 = arith.subf %308, %313 : vector<16x32xf32>
    %315 = arith.mulf %314, %314 : vector<16x32xf32>
    %cst_132 = arith.constant dense<0.000000e+00> : vector<16xf32>
    %316 = vector.multi_reduction <add>, %315, %cst_132 [1] : vector<16x32xf32> to vector<16xf32>
    %317 = vector.shape_cast %316 : vector<16xf32> to vector<16x1xf32>
    %cst_133 = arith.constant 3.200000e+01 : f32
    %318 = vector.broadcast %cst_133 : f32 to vector<16x1xf32>
    %319 = arith.divf %317, %318 : vector<16x1xf32>
    %320 = vector.broadcast %312 : vector<16x1xf32> to vector<16x32xf32>
    %321 = arith.subf %308, %320 : vector<16x32xf32>
    %cst_134 = arith.constant 9.99999996E-13 : f32
    %322 = vector.broadcast %cst_134 : f32 to vector<16x1xf32>
    %323 = arith.addf %319, %322 : vector<16x1xf32>
    %324 = math.rsqrt %323 : vector<16x1xf32>
    %325 = vector.broadcast %324 : vector<16x1xf32> to vector<16x32xf32>
    %326 = arith.mulf %321, %325 : vector<16x32xf32>
    %327 = vector.broadcast %235 : vector<1x32xf32> to vector<16x32xf32>
    %328 = arith.mulf %326, %327 : vector<16x32xf32>
    %329 = vector.broadcast %237 : vector<1x32xf32> to vector<16x32xf32>
    %330 = arith.addf %328, %329 : vector<16x32xf32>
    %cst_135 = arith.constant dense<0.000000e+00> : vector<16x64xf32>
    %331 = tpu.matmul %330, %239, %cst_135 {dimension_numbers = #tpu.dot_dimension_numbers<[1], [0], [0], [1], [0, 0, 1, 1], [], []>} : vector<16x32xf32>, vector<32x64xf32>, vector<16x64xf32> -> vector<16x64xf32>
    %332 = vector.broadcast %241 : vector<1x64xf32> to vector<16x64xf32>
    %333 = arith.addf %331, %332 : vector<16x64xf32>
    %334 = arith.mulf %333, %333 : vector<16x64xf32>
    %335 = arith.mulf %333, %334 : vector<16x64xf32>
    %cst_136 = arith.constant 4.471500e-02 : f32
    %336 = vector.broadcast %cst_136 : f32 to vector<16x64xf32>
    %337 = arith.mulf %336, %335 : vector<16x64xf32>
    %338 = arith.addf %333, %337 : vector<16x64xf32>
    %cst_137 = arith.constant 0.797884583 : f32
    %339 = vector.broadcast %cst_137 : f32 to vector<16x64xf32>
    %340 = arith.mulf %339, %338 : vector<16x64xf32>
    %341 = math.tanh %340 : vector<16x64xf32>
    %cst_138 = arith.constant 1.000000e+00 : f32
    %342 = vector.broadcast %cst_138 : f32 to vector<16x64xf32>
    %343 = arith.addf %342, %341 : vector<16x64xf32>
    %cst_139 = arith.constant 5.000000e-01 : f32
    %344 = vector.broadcast %cst_139 : f32 to vector<16x64xf32>
    %345 = arith.mulf %344, %343 : vector<16x64xf32>
    %346 = arith.mulf %333, %345 : vector<16x64xf32>
    %cst_140 = arith.constant dense<0.000000e+00> : vector<16x32xf32>
    %347 = tpu.matmul %346, %243, %cst_140 {dimension_numbers = #tpu.dot_dimension_numbers<[1], [0], [0], [1], [0, 0, 1, 1], [], []>} : vector<16x64xf32>, vector<64x32xf32>, vector<16x32xf32> -> vector<16x32xf32>
    %348 = vector.broadcast %245 : vector<1x32xf32> to vector<16x32xf32>
    %349 = arith.addf %347, %348 : vector<16x32xf32>
    %350 = arith.addf %330, %349 : vector<16x32xf32>
    %cst_141 = arith.constant dense<0.000000e+00> : vector<16xf32>
    %351 = vector.multi_reduction <add>, %350, %cst_141 [1] : vector<16x32xf32> to vector<16xf32>
    %352 = vector.shape_cast %351 : vector<16xf32> to vector<16x1xf32>
    %cst_142 = arith.constant 3.200000e+01 : f32
    %353 = vector.broadcast %cst_142 : f32 to vector<16x1xf32>
    %354 = arith.divf %352, %353 : vector<16x1xf32>
    %355 = vector.broadcast %354 : vector<16x1xf32> to vector<16x32xf32>
    %356 = arith.subf %350, %355 : vector<16x32xf32>
    %357 = arith.mulf %356, %356 : vector<16x32xf32>
    %cst_143 = arith.constant dense<0.000000e+00> : vector<16xf32>
    %358 = vector.multi_reduction <add>, %357, %cst_143 [1] : vector<16x32xf32> to vector<16xf32>
    %359 = vector.shape_cast %358 : vector<16xf32> to vector<16x1xf32>
    %cst_144 = arith.constant 3.200000e+01 : f32
    %360 = vector.broadcast %cst_144 : f32 to vector<16x1xf32>
    %361 = arith.divf %359, %360 : vector<16x1xf32>
    %362 = vector.broadcast %354 : vector<16x1xf32> to vector<16x32xf32>
    %363 = arith.subf %350, %362 : vector<16x32xf32>
    %cst_145 = arith.constant 9.99999996E-13 : f32
    %364 = vector.broadcast %cst_145 : f32 to vector<16x1xf32>
    %365 = arith.addf %361, %364 : vector<16x1xf32>
    %366 = math.rsqrt %365 : vector<16x1xf32>
    %367 = vector.broadcast %366 : vector<16x1xf32> to vector<16x32xf32>
    %368 = arith.mulf %363, %367 : vector<16x32xf32>
    %369 = vector.broadcast %247 : vector<1x32xf32> to vector<16x32xf32>
    %370 = arith.mulf %368, %369 : vector<16x32xf32>
    %371 = vector.broadcast %249 : vector<1x32xf32> to vector<16x32xf32>
    %372 = arith.addf %370, %371 : vector<16x32xf32>
    %c0_146 = arith.constant 0 : index
    %c0_147 = arith.constant 0 : index
    %373 = vector.load %arg18[%c0_146, %c0_147] : memref<16x32xf32, #tpu.memory_space<vmem>>, vector<16x32xf32>
    tpu.vector_store %arg18[%c0_146, %c0_147], %372 {strides = array<i32>} : memref<16x32xf32, #tpu.memory_space<vmem>>, vector<16x32xf32>,
    return
  }
}

</mosaic_0001>

<bundles_post_ra>
// kernel: tpu_custom_call.1
= control target key start
LH: loop header
LB: loop body
LE: loop exit
PB: predicated region body
PF: predicated region fallthrough
CT: control target
= control target key end

     0   :  { %s3725_s0 = inlined_call_operand.vmem [shape: s32[16], index: 0, kind: input, shape index: {}]   ;;  %s3726_s1 = inlined_call_operand.vmem [shape: f32[128,32], index: 1, kind: input, shape index: {}]   ;;  %s3727_s2 = inlined_call_operand.vmem [shape: f32[64,32], index: 2, kind: input, shape index: {}]   ;;  %s3728_s3 = inlined_call_operand.vmem [shape: f32[2,32], index: 3, kind: input, shape index: {}]   ;;  %s3729_s4 = inlined_call_operand.vmem [shape: f32[1,32], index: 4, kind: input, shape index: {}]   ;;  %s3730_s5 = inlined_call_operand.vmem [shape: f32[1,32], index: 5, kind: input, shape index: {}]   ;;  %s3731_s6 = inlined_call_operand.vmem [shape: f32[2,32,96], index: 6, kind: input, shape index: {}]   ;;  %s3732_s7 = inlined_call_operand.vmem [shape: f32[2,1,96], index: 7, kind: input, shape index: {}]   ;;  %s3733_s8 = inlined_call_operand.vmem [shape: f32[2,32,32], index: 8, kind: input, shape index: {}]   ;;  %s3734_s9 = inlined_call_operand.vmem [shape: f32[2,1,32], index: 9, kind: input, shape index: {}]   ;;  %s3735_s10 = inlined_call_operand.vmem [shape: f32[2,1,32], index: 10, kind: input, shape index: {}]   ;;  %s3736_s11 = inlined_call_operand.vmem [shape: f32[2,1,32], index: 11, kind: input, shape index: {}]   ;;  %s3737_s12 = inlined_call_operand.vmem [shape: f32[2,32,64], index: 12, kind: input, shape index: {}]   ;;  %s3738_s13 = inlined_call_operand.vmem [shape: f32[2,1,64], index: 13, kind: input, shape index: {}]   ;;  %s3739_s14 = inlined_call_operand.vmem [shape: f32[2,64,32], index: 14, kind: input, shape index: {}]   ;;  %s3740_s15 = inlined_call_operand.vmem [shape: f32[2,1,32], index: 15, kind: input, shape index: {}]   ;;  %s3741_s16 = inlined_call_operand.vmem [shape: f32[2,1,32], index: 16, kind: input, shape index: {}]   ;;  %s3742_s17 = inlined_call_operand.vmem [shape: f32[2,1,32], index: 17, kind: input, shape index: {}]   ;;  %s3743_s18 = inlined_call_operand.hbm [shape: f32[16,32], index: 18, kind: output, shape index: {}]  }
   0x1   :  { %3754 = sst [smem:[#allocation8_spill]] %s3725_s0 }
   0x2   :  { %3755 = sst [smem:[#allocation9_spill]] %s3726_s1 }
   0x3   :  { %3756 = sst [smem:[#allocation10_spill]] %s3727_s2 }
   0x4   :  { %3757 = sst [smem:[#allocation11_spill]] %s3735_s10 }
   0x5   :  { %3758 = sst [smem:[#allocation12_spill]] %s3736_s11 }
   0x6   :  { %3759 = sst [smem:[#allocation13_spill]] %s3737_s12 }
   0x7   :  { %3760 = sst [smem:[#allocation14_spill]] %s3738_s13 }
   0x8   :  { %3761 = sst [smem:[#allocation15_spill]] %s3739_s14 }
   0x9   :  { %3762 = sst [smem:[#allocation16_spill]] %s3740_s15 }
   0xa   :  { %3763 = sst [smem:[#allocation17_spill]] %s3741_s16 }
   0xb   :  { %3764 = sst [smem:[#allocation18_spill]] %s3742_s17 }
   0xc   :  { %3765 = sst [smem:[#allocation19_spill]] %s3743_s18 }
   0xd   :  { %23 = vsyncpa [#allocation4], 0 }
   0xe   :  { %24 = vsyncpa [#allocation3], 0  ;;  %s3766_s29 = sld [smem:[#allocation8_spill]] }
  0x14   :  { %s31_s30 = sshll.u32 %s3766_s29, 4  ;;  %s32_s30 = int_to_ptr.vmem [resolvable:$true] %s31_s30 }
  0x15   :  { %s3122_s0 = scalar_lea.vmem %s32_s30, 16  ;;  %p3127_p1 = scmp.lt.s32.totalorder %s32_s30, %s32_s30 }
  0x16   :  { %p3123_p0 = scmp.ne.s32.totalorder %s32_s30, %s3122_s0  ;;  %p3128_p2 = scmp.lt.s32.totalorder %s3122_s0, %s3122_s0 }
  0x18   :  { %p3129_p3 = por %p3128_p2, %p3127_p1 }
  0x1a   :  { %p3130_p4 = pnand %p3129_p3, %p3123_p0 }
  0x1c   :  { %3133 = shalt.err (!%p3130_p4)
}
  0x1d   :  { %s3160_s19 = smov [#allocation2]  }
  0x1e   :  { %34 = dma.vmem_to_smem %s32_s30, 16, %s3160_s19, [#allocation4]  }
  0x1f   :  { %3156 = dma.done.wait [#allocation4], 16  }
  0x20   :  { %3157 = vsyncadd [#allocation4], 4294967280 }
  0x21   :  { %72 = sfence }
  0x22   :  { %s73_s1 = sld [smem:[#allocation2]]  ;;  %s2598_s20 = sld [smem:[#allocation2 + $0x1]]  ;;  %vm163_vm0 = vcmask 1040384   ;;  %vm165_vm1 = vcmask 1041408   ;;  %vm167_vm2 = vcmask 1042432   ;;  %vm169_vm3 = vcmask 1043456  }
  0x23   :  { %s2599_s21 = sld [smem:[#allocation2 + $0x2]]  ;;  %s2600_s22 = sld [smem:[#allocation2 + $0x3]]  ;;  %vm171_vm4 = vcmask 1044480   ;;  %vm173_vm5 = vcmask 1045504   ;;  %vm175_vm6 = vcmask 1046528   ;;  %vm196_vm7 = vcmask 261120  }
  0x24   :  { %s2601_s2 = sld [smem:[#allocation2 + $0x4]]  ;;  %s2602_s23 = sld [smem:[#allocation2 + $0x5]]  ;;  %v2613_v28 = vld [vmem:[%s3728_s3] ss:$0 sm:$0xff]  ;;  %v241_v63 = vld [vmem:[%s3731_s6 + $0x8] sm:$0xff]  ;;  %vm3162_vm8 = vmmov 0  }
  0x25   :  { %s2603_s24 = sld [smem:[#allocation2 + $0x6]]  ;;  %s2604_s25 = sld [smem:[#allocation2 + $0x7]]  ;;  %v240_v62 = vld [vmem:[%s3731_s6] sm:$0xff]  ;;  %vm363_vm9 = vcmask 130048   ;;  %vm670_vm10 = vcmask 64512   ;;  %vm1271_vm11 = vcmask 523264  }
  0x26   :  { %s3268_s26 = sld [smem:[#allocation2 + $0x8]]  ;;  %s3270_s27 = sld [smem:[#allocation2 + $0x9]] }
  0x27   :  { %s3272_s28 = sld [smem:[#allocation2 + $0xa]]  ;;  %s3767_s30 = sld [smem:[#allocation9_spill]] }
  0x28   :  { %s2608_s29 = sld [smem:[#allocation2 + $0xb]]  ;;  %s2612_s13 = sld [smem:[#allocation2 + $0xf]] }
  0x29   :  { %s3769_s18 = sld [smem:[#allocation13_spill]]  ;;  %s3772_s3 = sld [smem:[#allocation15_spill]] }
  0x2d   :  { %s74_s19 = scalar_lea.vmem %s3767_s30, %s73_s1  ;;  %s77_s16 = scalar_lea.vmem %s3767_s30, %s2598_s20 }
  0x2e   :  { %v75_v0 = vld [vmem:[%s74_s19] sm:$0x1]  ;;  %s80_s14 = scalar_lea.vmem %s3767_s30, %s2599_s21  ;;  %s83_s12 = scalar_lea.vmem %s3767_s30, %s2600_s22 }
  0x2f   :  { %v78_v1 = vld [vmem:[%s77_s16] sm:$0x1]  ;;  %s86_s17 = scalar_lea.vmem %s3767_s30, %s2601_s2  ;;  %s89_s16 = scalar_lea.vmem %s3767_s30, %s2602_s23 }
  0x30   :  { %v81_v2 = vld [vmem:[%s80_s14] sm:$0x1]  ;;  %v122_v4 = vrot.slane %v78_v1, 7  ;;  %s92_s11 = scalar_lea.vmem %s3767_s30, %s2603_s24  ;;  %s95_s15 = scalar_lea.vmem %s3767_s30, %s2604_s25  ;;  %v2972_v1 = vpack.c.bf16 %v241_v63, %v240_v62 }
  0x31   :  { %v84_v3 = vld [vmem:[%s83_s12] sm:$0x1]  ;;  %v125_v7 = vrot.slane %v81_v2, 6  ;;  %s98_s2 = scalar_lea.vmem %s3767_s30, %s3268_s26  ;;  %s101_s25 = scalar_lea.vmem %s3767_s30, %s3270_s27  ;;  %v243_v2 = vld [vmem:[%s3731_s6 + $0x18] sm:$0xff] }
  0x32   :  { %v87_v5 = vld [vmem:[%s86_s17] sm:$0x1]  ;;  %v128_v8 = vrot.slane %v84_v3, 5  ;;  %v164_v13 = vsel %vm163_vm0, %v75_v0, %v122_v4  ;;  %s104_s1 = scalar_lea.vmem %s3767_s30, %s3272_s28  ;;  %s2609_s26 = sld [smem:[#allocation2 + $0xc]]  ;;  %v242_v0 = vld [vmem:[%s3731_s6 + $0x10] sm:$0xff]  ;;  %2973 = vmatprep.subr.bf16.mxu1 %v2972_v1 }
  0x33   :  { %v90_v6 = vld [vmem:[%s89_s16] sm:$0x1]  ;;  %v131_v11 = vrot.slane %v87_v5, 4  ;;  %v166_v16 = vsel %vm165_vm1, %v164_v13, %v125_v7  ;;  %s2610_s17 = sld [smem:[#allocation2 + $0xd]]  ;;  %s3768_s27 = sld [smem:[#allocation10_spill]]  ;;  %v2976_v3 = vpack.c.bf16 %v243_v2, %v242_v0  ;;  %2975 = vmatpush3.bf16.msra.mxu1 %v2972_v1 }
  0x34   :  { %v93_v9 = vld [vmem:[%s92_s11] sm:$0x1]  ;;  %v134_v12 = vrot.slane %v90_v6, 3  ;;  %v168_v18 = vsel %vm167_vm2, %v166_v16, %v128_v8  ;;  %s2611_s16 = sld [smem:[#allocation2 + $0xe]]  ;;  %s107_s12 = scalar_lea.vmem %s3767_s30, %s2608_s29 }
  0x35   :  { %v96_v10 = vld [vmem:[%s95_s15] sm:$0x1]  ;;  %v137_v14 = vrot.slane %v93_v9, 2  ;;  %v170_v21 = vsel %vm169_vm3, %v168_v18, %v131_v11  ;;  %s119_s29 = scalar_lea.vmem %s3767_s30, %s2612_s13  ;;  %2977 = vmatprep.subr.bf16.mxu1 %v2976_v3  ;;  %s3164_s15 = smov 96  }
  0x36   :  { %v140_v15 = vrot.slane %v96_v10, 1  ;;  %v99_v17 = vld [vmem:[%s98_s2] sm:$0x1]  ;;  %v172_v23 = vsel %vm171_vm4, %v170_v21, %v134_v12  ;;  %s3165_s21 = smov 64   ;;  %s3771_s2 = sld [smem:[#allocation12_spill]] }
  0x37   :  { %v102_v19 = vld [vmem:[%s101_s25] sm:$0x1]  ;;  %v174_v25 = vsel %vm173_vm5, %v172_v23, %v137_v14  ;;  %2979 = vmatpush3.bf16.msra.mxu1 %v2976_v3  ;;  %s3774_s25 = sld [smem:[#allocation16_spill]]  ;;  %s3775_s28 = sld [smem:[#allocation17_spill]] }
  0x38   :  { %v105_v20 = vld [vmem:[%s104_s1] sm:$0x1]  ;;  %v143_v22 = vrot.slane %v102_v19, 7  ;;  %v176_v27 = vsel %vm175_vm6, %v174_v25, %v140_v15  ;;  %s110_s22 = scalar_lea.vmem %s3767_s30, %s2609_s26  ;;  %s3166_s1 = smov 16  }
  0x39   :  { %v184_v24 = vld [vmem:[%s3768_s27] sm:$0xff]  ;;  %v146_v26 = vrot.slane %v105_v20, 6  ;;  %s113_s24 = scalar_lea.vmem %s3767_s30, %s2610_s17  ;;  %v3161_v20 = vmov 0.0   ;;  %s3776_s11 = sld [smem:[#allocation18_spill]] }
  0x3a   :  { %v177_v29 = vsel %vm163_vm0, %v99_v17, %v143_v22  ;;  %v185_v30 = vadd.f32 %v184_v24, %v176_v27  ;;  %v108_v32 = vld [vmem:[%s107_s12] sm:$0x1]  ;;  %s116_s0 = scalar_lea.vmem %s3767_s30, %s2611_s16  ;;  %2799 = vmatprep.subr.mxu1 %v3161_v20  ;;  %2809 = vmatprep.subr.mxu0 %v3161_v20  ;;  %s3163_s12 = smov 112  }
  0x3b   :  { %v178_v33 = vsel %vm165_vm1, %v177_v29, %v146_v26  ;;  %v111_v34 = vld [vmem:[%s110_s22] sm:$0x1]  ;;  %v149_v36 = vrot.slane %v108_v32, 5  ;;  %2811 = vmatprep.mubr.msk.f32.mxu0 %vm3162_vm8, %v3161_v20  ;;  %s3773_s22 = sld [smem:[#allocation14_spill]]  ;;  %s3167_s16 = smov [#allocation5]  }
  0x3c   :  { %v192_v31 = vadd.f32 %v2613_v28, %v185_v30  ;;  %v114_v35 = vld [vmem:[%s113_s24] sm:$0x1]  ;;  %v152_v40 = vrot.slane %v111_v34, 4  ;;  %s2570_s13 = sshll.u32 %s3167_s16, 4  ;;  %s2571_s13 = int_to_ptr.vmem [resolvable:$true] %s2570_s13 }
  0x3d   :  { %v117_v38 = vld [vmem:[%s116_s0] sm:$0x1]  ;;  %v155_v41 = vrot.slane %v114_v35, 3  ;;  %v179_v44 = vsel %vm167_vm2, %v178_v33, %v149_v36  ;;  %p3139_p6 = scmp.lt.s32.totalorder %s2571_s13, %s2571_s13 }
  0x3e   :  { %v197_v37 = vsel %vm196_vm7, %v192_v31, 0.0  ;;  %v120_v39 = vld [vmem:[%s119_s29] sm:$0x1]  ;;  %v158_v42 = vrot.slane %v117_v38, 2  ;;  %v180_v45 = vsel %vm169_vm3, %v179_v44, %v152_v40 }
  0x3f   :  { %198 = vadd.xlane.f32.xlu0 %v197_v37  ;;  %v161_v43 = vrot.slane %v120_v39, 1  ;;  %v181_v46 = vsel %vm171_vm4, %v180_v45, %v155_v41  ;;  %v2614_v11 = vld [vmem:[%s3729_s4] ss:$0 sm:$0xff]  ;;  %s3770_s4 = sld [smem:[#allocation11_spill]] }
  0x40   :  { %v182_v47 = vsel %vm173_vm5, %v181_v46, %v158_v42  ;;  %v2615_v13 = vld [vmem:[%s3730_s5] ss:$0 sm:$0xff] }
  0x41   :  { %v183_v48 = vsel %vm175_vm6, %v182_v47, %v161_v43  ;;  %v2616_v21 = vld [vmem:[%s3732_s7] ss:$0 sm:$0xff] }
  0x42   :  { %v186_v49 = vadd.f32 %v184_v24, %v183_v48 }
  0x44   :  { %v193_v50 = vadd.f32 %v2613_v28, %v186_v49 }
  0x46   :  { %v200_v51 = vsel %vm196_vm7, %v193_v50, 0.0 }
  0x47   :  { %201 = vadd.xlane.f32.xlu0 %v200_v51 }
  0xcc   :  { %v199_v52 = vpop.xlane.xlu0 %198 }
  0xcd   :  { %v204_v53 = vmul.f32 0.03125, %v199_v52 }
  0xcf   :  { %v206_v54 = vsub.f32 %v192_v31, %v204_v53 }
  0xd1   :  { %v208_v55 = vmul.f32 %v206_v54, %v206_v54 }
  0xd3   :  { %v210_v56 = vsel %vm196_vm7, %v208_v55, 0.0 }
  0xd4   :  { %211 = vadd.xlane.f32.xlu1 %v210_v56  ;;  %v202_v57 = vpop.xlane.xlu0 %201 }
  0xd5   :  { %v205_v58 = vmul.f32 0.03125, %v202_v57 }
  0xd7   :  { %v207_v59 = vsub.f32 %v193_v50, %v205_v58 }
  0xd9   :  { %v209_v60 = vmul.f32 %v207_v59, %v207_v59 }
  0xdb   :  { %v213_v61 = vsel %vm196_vm7, %v209_v60, 0.0 }
  0xdc   :  { %214 = vadd.xlane.f32.xlu1 %v213_v61 }
 0x161   :  { %v212_v4 = vpop.xlane.xlu1 %211 }
 0x162   :  { %v216_v5 = vmul.f32 0.03125, %v212_v4 }
 0x164   :  { %v218_v6 = vadd.f32 1e-12, %v216_v5 }
 0x166   :  { %3062 = vrsqrt.f32 %v218_v6 }
 0x169   :  { %v215_v7 = vpop.xlane.xlu1 %214 }
 0x16a   :  { %v217_v8 = vmul.f32 0.03125, %v215_v7 }
 0x16c   :  { %v219_v9 = vadd.f32 1e-12, %v217_v8 }
 0x16e   :  { %3064 = vrsqrt.f32 %v219_v9 }
 0x170   :  { %v3063_v10 = vpop.eup %3062 }
 0x171   :  { %v222_v12 = vmul.f32 %v3063_v10, %v206_v54 }
 0x173   :  { %v230_v14 = vmul.f32 %v2614_v11, %v222_v12 }
 0x175   :  { %v3367_v15 = vadd.f32 %v2615_v13, %v230_v14 }
 0x177   :  { %2796 = vmatprep.mubr.msk.f32.mxu1 %vm196_vm7, %v3367_v15 }
 0x178   :  { %v3065_v16 = vpop.eup %3064 }
 0x179   :  { %v223_v17 = vmul.f32 %v3065_v16, %v207_v59 }
 0x17b   :  { %v231_v18 = vmul.f32 %v2614_v11, %v223_v17 }
 0x17d   :  { %v3371_v19 = vadd.f32 %v2615_v13, %v231_v18 }
 0x17f   :  { %2797 = vmatmul.mubr.msk.f32.vlgmr.msra.gmra.mrb[0].mxu1 %vm196_vm7, %v3371_v19 }
 0x180   :  { %2801 = vmatprep.mubr.msk.f32.mxu1 %vm3162_vm8, %v3161_v20 }
 0x252   :  { %v2798_v22 = vpop.f32.mrb[0].mxu1 }
 0x253   :  { %v3384_v23 = vadd.f32 %v2798_v22, %v2616_v21  ;;  %v346_v24 = vpop.f32.mrb[1].mxu1 }
 0x254   :  { %v3386_v25 = vadd.f32 %v2616_v21, %v346_v24  ;;  %v246_v24 = vld [vmem:[%s3733_s8 + $0x8] sm:$0xff] }
 0x255   :  { %359 = vrot.lane.b32.xlu1 %v3384_v23, %s3163_s12 }
 0x256   :  { %356 = vrot.lane.b32.xlu0 %v3386_v25, %s3163_s12 }
 0x259   :  { %361 = vrot.lane.b32.xlu1 %v3386_v25, %s3164_s15 }
 0x2c7   :  { %v360_v26 = vpop.permute.xlu1 %359 }
 0x2c8   :  { %590 = vrot.lane.b32.xlu0 %v360_v26, %s3164_s15  ;;  %v357_v27 = vpop.permute.xlu0 %356 }
 0x2c9   :  { %438 = vrot.lane.b32.xlu1 %v357_v27, %s3164_s15 }
 0x2cb   :  { %v362_v28 = vpop.permute.xlu1 %361 }
 0x2cc   :  { %2800 = vmatpush3.xpose.msk.msra.mxu1 %vm363_vm9, %v362_v28 }
 0x2cd   :  { %514 = vrot.lane.b32.xlu1 %v3384_v23, %s3164_s15  ;;  %2804 = vmatprep.subr.mxu1 %v3161_v20 }
 0x2cf   :  { %2802 = vmatmul.mubr.msk.f32.vlgmr.msra.gmra.mrb[2].mxu1 %vm363_vm9, %v3386_v25 }
 0x2d0   :  { %2806 = vmatprep.mubr.msk.f32.mxu1 %vm3162_vm8, %v3161_v20 }
 0x33a   :  { %v591_v30 = vpop.permute.xlu0 %590 }
 0x33b   :  { %v439_v29 = vpop.permute.xlu1 %438 }
 0x33c   :  { %2805 = vmatpush3.xpose.msk.msra.mxu1 %vm363_vm9, %v439_v29 }
 0x33d   :  { %2814 = vmatprep.subr.mxu1 %v3161_v20 }
 0x33f   :  { %2807 = vmatmul.mubr.msk.f32.vlgmr.msra.gmra.mrb[4].mxu1 %vm363_vm9, %v357_v27  ;;  %v515_v31 = vpop.permute.xlu1 %514 }
 0x340   :  { %2810 = vmatpush3.xpose.msk.msra.mxu0 %vm363_vm9, %v515_v31  ;;  %2815 = vmatpush3.xpose.msk.msra.mxu1 %vm363_vm9, %v591_v30 }
 0x341   :  { %2816 = vmatprep.mubr.msk.f32.mxu1 %vm3162_vm8, %v3161_v20  ;;  %2824 = vmatprep.subr.mxu1 %v3161_v20 }
 0x342   :  { %2819 = vmatprep.subr.mxu0 %v3161_v20 }
 0x343   :  { %2812 = vmatmul.mubr.msk.f32.vlgmr.msra.gmra.mrb[0].mxu0 %vm363_vm9, %v3384_v23  ;;  %2817 = vmatmul.mubr.msk.f32.vlgmr.msra.gmra.mrb[6].mxu1 %vm363_vm9, %v360_v26 }
 0x344   :  { %2826 = vmatprep.mubr.msk.f32.mxu1 %vm3162_vm8, %v3161_v20  ;;  %2821 = vmatprep.mubr.msk.f32.mxu0 %vm3162_vm8, %v3161_v20 }
 0x3a2   :  { %v434_v32 = vpop.f32.mrb[2].mxu1 }
 0x3a3   :  { %v2803_v33 = vpop.f32.mrb[3].mxu1  ;;  %v666_v37 = vmul.f32 0.25, %v434_v32 }
 0x3a5   :  { %v671_v45 = vsel %vm670_vm10, %v666_v37, -inf }
 0x412   :  { %v510_v34 = vpop.f32.mrb[4].mxu1 }
 0x413   :  { %v667_v35 = vmul.f32 0.25, %v510_v34  ;;  %v2808_v36 = vpop.f32.mrb[5].mxu1 }
 0x415   :  { %v674_v38 = vsel %vm670_vm10, %v667_v35, -inf }
 0x416   :  { %675 = vmax.xlane.f32.xlu0 %v674_v38  ;;  %v586_v39 = vpop.f32.mrb[0].mxu0  ;;  %v662_v40 = vpop.f32.mrb[6].mxu1 }
 0x417   :  { %v669_v41 = vmul.f32 0.25, %v662_v40  ;;  %v2813_v42 = vpop.f32.mrb[1].mxu0  ;;  %v2818_v43 = vpop.f32.mrb[7].mxu1  ;;  %v668_v44 = vmul.f32 0.25, %v586_v39 }
 0x419   :  { %v680_v46 = vsel %vm670_vm10, %v669_v41, -inf  ;;  %v677_v47 = vsel %vm670_vm10, %v668_v44, -inf }
 0x41a   :  { %672 = vmax.xlane.f32.xlu0 %v671_v45  ;;  %681 = vmax.xlane.f32.xlu1 %v680_v46 }
 0x41e   :  { %678 = vmax.xlane.f32.xlu0 %v677_v47 }
 0x4a3   :  { %v676_v48 = vpop.xlane.xlu0 %675 }
 0x4a4   :  { %v684_v49 = vsub.f32 %v667_v35, %v676_v48 }
 0x4a6   :  { %v689_v50 = vmul.f32 1.442695, %v684_v49 }
 0x4a7   :  { %v682_v51 = vpop.xlane.xlu1 %681  ;;  %v673_v58 = vpop.xlane.xlu0 %672 }
 0x4a8   :  { %3066 = vpow2.f32 %v689_v50  ;;  %v686_v52 = vsub.f32 %v669_v41, %v682_v51  ;;  %v683_v62 = vsub.f32 %v666_v37, %v673_v58  ;;  %v2631_v41 = vld [vmem:[%s3734_s9] ss:$0 sm:$0xff] }
 0x4aa   :  { %v693_v53 = vmul.f32 1.442695, %v686_v52  ;;  %v687_v63 = vmul.f32 1.442695, %v683_v62  ;;  %v255_v62 = vld [vmem:[%s3769_s18 + $0x18] sm:$0xff] }
 0x4ab   :  { %v679_v59 = vpop.xlane.xlu0 %678 }
 0x4ac   :  { %3068 = vpow2.f32 %v693_v53  ;;  %v685_v60 = vsub.f32 %v668_v44, %v679_v59  ;;  %v253_v59 = vld [vmem:[%s3769_s18 + $0x8] sm:$0xff] }
 0x4ae   :  { %v691_v61 = vmul.f32 1.442695, %v685_v60 }
 0x4b0   :  { %3070 = vpow2.f32 %v691_v61  ;;  %v254_v61 = vld [vmem:[%s3769_s18 + $0x10] sm:$0xff] }
 0x4b1   :  { %3072 = vpow2.f32 %v687_v63  ;;  %v2992_v63 = vpack.c.bf16 %v255_v62, %v254_v61 }
 0x4b2   :  { %v3067_v54 = vpop.eup %3066 }
 0x4b3   :  { %v698_v55 = vsel %vm670_vm10, %v3067_v54, 0.0 }
 0x4b4   :  { %699 = vadd.xlane.f32.xlu0 %v698_v55 }
 0x4b6   :  { %v3069_v56 = vpop.eup %3068 }
 0x4b7   :  { %v704_v57 = vsel %vm670_vm10, %v3069_v56, 0.0 }
 0x4b8   :  { %705 = vadd.xlane.f32.xlu1 %v704_v57 }
 0x4ba   :  { %v3071_v0 = vpop.eup %3070 }
 0x4bb   :  { %v701_v1 = vsel %vm670_vm10, %v3071_v0, 0.0  ;;  %v3073_v2 = vpop.eup %3072 }
 0x4bc   :  { %v695_v3 = vsel %vm670_vm10, %v3073_v2, 0.0 }
 0x4c9   :  { %943 = vrot.lane.b32.xlu1 %v360_v26, %s3165_s21  ;;  %v247_v26 = vld [vmem:[%s3733_s8 + $0x10] sm:$0xff] }
 0x4ca   :  { %791 = vrot.lane.b32.xlu0 %v357_v27, %s3165_s21  ;;  %v248_v27 = vld [vmem:[%s3733_s8 + $0x18] sm:$0xff] }
 0x4cb   :  { %v2984_v28 = vpack.c.bf16 %v248_v27, %v247_v26  ;;  %v262_v26 = vld [vmem:[%s3772_s3 + $0x28] sm:$0xff] }
 0x4e9   :  { %702 = vadd.xlane.f32.xlu0 %v701_v1 }
 0x4ed   :  { %696 = vadd.xlane.f32.xlu1 %v695_v3 }
 0x4fe   :  { %867 = vrot.lane.b32.xlu1 %v3384_v23, %s3165_s21  ;;  %v245_v23 = vld [vmem:[%s3733_s8] sm:$0xff] }
 0x4ff   :  { %715 = vrot.lane.b32.xlu0 %v3386_v25, %s3165_s21  ;;  %v2980_v25 = vpack.c.bf16 %v246_v24, %v245_v23  ;;  %v260_v23 = vld [vmem:[%s3772_s3 + $0x18] sm:$0xff] }
 0x541   :  { %v700_v4 = vpop.xlane.xlu0 %699 }
 0x542   :  { %3074 = vrcp.f32 %v700_v4 }
 0x545   :  { %v792_v5 = vpop.permute.xlu0 %791  ;;  %v706_v6 = vpop.xlane.xlu1 %705 }
 0x546   :  { %2825 = vmatpush3.msra.mxu1 %v792_v5  ;;  %3076 = vrcp.f32 %v706_v6 }
 0x547   :  { %2834 = vmatprep.subr.mxu1 %v3161_v20 }
 0x549   :  { %v944_v9 = vpop.permute.xlu1 %943 }
 0x54c   :  { %v3075_v7 = vpop.eup %3074 }
 0x54d   :  { %v712_v8 = vmul.f32 %v3075_v7, %v3067_v54  ;;  %v2634_v7 = vld [vmem:[%s3770_s4] ss:$0 sm:$0xff] }
 0x54f   :  { %2827 = vmatmul.mubr.msk.f32.vlgmr.msra.gmra.mrb[8].mxu1 %vm670_vm10, %v712_v8 }
 0x550   :  { %2835 = vmatpush3.msra.mxu1 %v944_v9  ;;  %2836 = vmatprep.mubr.msk.f32.mxu1 %vm3162_vm8, %v3161_v20  ;;  %v3077_v10 = vpop.eup %3076  ;;  %v2635_v9 = vld [vmem:[%s3771_s2] ss:$0 sm:$0xff] }
 0x551   :  { %v714_v11 = vmul.f32 %v3077_v10, %v3069_v56 }
 0x553   :  { %2837 = vmatmul.mubr.msk.f32.vlgmr.msra.gmra.mrb[10].mxu1 %vm670_vm10, %v714_v11 }
 0x576   :  { %v703_v12 = vpop.xlane.xlu0 %702 }
 0x57a   :  { %v716_v13 = vpop.permute.xlu0 %715  ;;  %v697_v14 = vpop.xlane.xlu1 %696 }
 0x57b   :  { %2820 = vmatpush3.msra.mxu0 %v716_v13  ;;  %3078 = vrcp.f32 %v697_v14 }
 0x57c   :  { %2829 = vmatprep.subr.mxu0 %v3161_v20  ;;  %3080 = vrcp.f32 %v703_v12 }
 0x57e   :  { %v868_v21 = vpop.permute.xlu1 %867 }
 0x585   :  { %v3079_v16 = vpop.eup %3078 }
 0x586   :  { %v711_v17 = vmul.f32 %v3079_v16, %v3073_v2  ;;  %v3081_v18 = vpop.eup %3080 }
 0x587   :  { %v713_v22 = vmul.f32 %v3081_v18, %v3071_v0  ;;  %v258_v18 = vld [vmem:[%s3772_s3 + $0x8] sm:$0xff] }
 0x588   :  { %2822 = vmatmul.mubr.msk.f32.vlgmr.msra.gmra.mrb[2].mxu0 %vm670_vm10, %v711_v17  ;;  %v257_v17 = vld [vmem:[%s3772_s3] sm:$0xff] }
 0x589   :  { %2830 = vmatpush3.msra.mxu0 %v868_v21  ;;  %2831 = vmatprep.mubr.msk.f32.mxu0 %vm3162_vm8, %v3161_v20  ;;  %v2996_v21 = vpack.c.bf16 %v258_v18, %v257_v17 }
 0x58a   :  { %2981 = vmatprep.subr.bf16.mxu0 %v2980_v25 }
 0x58c   :  { %2832 = vmatmul.mubr.msk.f32.vlgmr.msra.gmra.mrb[4].mxu0 %vm670_vm10, %v713_v22  ;;  %v259_v22 = vld [vmem:[%s3772_s3 + $0x10] sm:$0xff] }
 0x58d   :  { %2983 = vmatpush3.bf16.msra.mxu0 %v2980_v25  ;;  %v3000_v24 = vpack.c.bf16 %v260_v23, %v259_v22  ;;  %v261_v25 = vld [vmem:[%s3772_s3 + $0x20] sm:$0xff] }
 0x58e   :  { %2985 = vmatprep.subr.bf16.mxu0 %v2984_v28  ;;  %v3004_v27 = vpack.c.bf16 %v262_v26, %v261_v25  ;;  %v2642_v23 = vld [vmem:[%s3775_s28] ss:$0 sm:$0xff] }
 0x591   :  { %2987 = vmatpush3.bf16.msra.mxu0 %v2984_v28  ;;  %v263_v28 = vld [vmem:[%s3772_s3 + $0x30] sm:$0xff] }
 0x592   :  { %2997 = vmatprep.subr.bf16.mxu0 %v2996_v21 }
 0x622   :  { %v863_v29 = vpop.f32.mrb[8].mxu1 }
 0x623   :  { %v2828_v30 = vpop.f32.mrb[9].mxu1  ;;  %1020 = vrot.lane.b32.xlu1 %v863_v29, %s3166_s1  ;;  %v264_v29 = vld [vmem:[%s3772_s3 + $0x38] sm:$0xff] }
 0x624   :  { %v3008_v30 = vpack.c.bf16 %v264_v29, %v263_v28 }
 0x626   :  { %v1015_v31 = vpop.f32.mrb[10].mxu1 }
 0x627   :  { %1025 = vrot.lane.b32.xlu1 %v1015_v31, %s3166_s1  ;;  %v2838_v32 = vpop.f32.mrb[11].mxu1  ;;  %v2636_v31 = vld [vmem:[%s3773_s22] ss:$0 sm:$0xff] }
 0x65b   :  { %v787_v33 = vpop.f32.mrb[2].mxu0 }
 0x65c   :  { %v2823_v34 = vpop.f32.mrb[3].mxu0 }
 0x65f   :  { %v939_v35 = vpop.f32.mrb[4].mxu0 }
 0x660   :  { %v2833_v36 = vpop.f32.mrb[5].mxu0 }
 0x695   :  { %v1021_v37 = vpop.permute.xlu1 %1020 }
 0x696   :  { %v1023_v38 = vsel %vm363_vm9, %v787_v33, %v1021_v37 }
 0x697   :  { %2847 = vmatprep.mubr.msk.f32.mxu0 %vm196_vm7, %v1023_v38 }
 0x699   :  { %v1026_v39 = vpop.permute.xlu1 %1025 }
 0x69a   :  { %v1028_v40 = vsel %vm363_vm9, %v939_v35, %v1026_v39 }
 0x69b   :  { %2848 = vmatmul.mubr.msk.f32.vlgmr.msra.gmra.mrb[6].mxu0 %vm196_vm7, %v1028_v40 }
 0x69c   :  { %2999 = vmatpush3.bf16.msra.mxu0 %v2996_v21 }
 0x69d   :  { %3001 = vmatprep.subr.bf16.mxu0 %v3000_v24 }
 0x6a0   :  { %3003 = vmatpush3.bf16.msra.mxu0 %v3000_v24 }
 0x6a1   :  { %3005 = vmatprep.subr.bf16.mxu0 %v3004_v27 }
 0x6a4   :  { %3007 = vmatpush3.bf16.msra.mxu0 %v3004_v27  ;;  %v2643_v27 = vld [vmem:[%s3776_s11] ss:$0 sm:$0xff] }
 0x6a5   :  { %3009 = vmatprep.subr.bf16.mxu0 %v3008_v30 }
 0x6a8   :  { %3011 = vmatpush3.bf16.msra.mxu0 %v3008_v30 }
 0x6a9   :  { %2901 = vmatprep.subr.mxu0 %v3161_v20 }
 0x76e   :  { %v2849_v42 = vpop.f32.mrb[6].mxu0 }
 0x76f   :  { %v1113_v43 = vadd.f32 %v2849_v42, %v2631_v41  ;;  %v1107_v44 = vpop.f32.mrb[7].mxu0 }
 0x770   :  { %v1108_v45 = vadd.f32 %v2631_v41, %v1107_v44 }
 0x771   :  { %v1117_v46 = vadd.f32 %v1113_v43, %v3371_v19 }
 0x772   :  { %v1116_v47 = vadd.f32 %v1108_v45, %v3367_v15  ;;  %v252_v15 = vld [vmem:[%s3769_s18] sm:$0xff] }
 0x773   :  { %v1121_v48 = vsel %vm196_vm7, %v1117_v46, 0.0  ;;  %v2988_v60 = vpack.c.bf16 %v253_v59, %v252_v15 }
 0x774   :  { %1122 = vadd.xlane.f32.xlu1 %v1121_v48  ;;  %v1118_v49 = vsel %vm196_vm7, %v1116_v47, 0.0 }
 0x775   :  { %1119 = vadd.xlane.f32.xlu0 %v1118_v49  ;;  %2989 = vmatprep.subr.bf16.mxu1 %v2988_v60 }
 0x776   :  { %2991 = vmatpush3.bf16.msra.mxu1 %v2988_v60 }
 0x777   :  { %2993 = vmatprep.subr.bf16.mxu1 %v2992_v63 }
 0x77a   :  { %2995 = vmatpush3.bf16.msra.mxu1 %v2992_v63 }
 0x801   :  { %v1123_v50 = vpop.xlane.xlu1 %1122 }
 0x802   :  { %v1125_v51 = vmul.f32 0.03125, %v1123_v50  ;;  %v1120_v52 = vpop.xlane.xlu0 %1119 }
 0x803   :  { %v1124_v53 = vmul.f32 0.03125, %v1120_v52 }
 0x804   :  { %v1127_v54 = vsub.f32 %v1117_v46, %v1125_v51 }
 0x805   :  { %v1126_v55 = vsub.f32 %v1116_v47, %v1124_v53 }
 0x806   :  { %v1129_v58 = vmul.f32 %v1127_v54, %v1127_v54 }
 0x807   :  { %v1128_v56 = vmul.f32 %v1126_v55, %v1126_v55 }
 0x808   :  { %v1133_v19 = vsel %vm196_vm7, %v1129_v58, 0.0 }
 0x809   :  { %v1130_v57 = vsel %vm196_vm7, %v1128_v56, 0.0 }
 0x80a   :  { %1131 = vadd.xlane.f32.xlu0 %v1130_v57 }
 0x80e   :  { %1134 = vadd.xlane.f32.xlu0 %v1133_v19 }
 0x897   :  { %v1132_v0 = vpop.xlane.xlu0 %1131 }
 0x898   :  { %v1136_v1 = vmul.f32 0.03125, %v1132_v0 }
 0x89a   :  { %v1138_v2 = vadd.f32 1e-12, %v1136_v1 }
 0x89b   :  { %v1135_v3 = vpop.xlane.xlu0 %1134 }
 0x89c   :  { %3082 = vrsqrt.f32 %v1138_v2  ;;  %v1137_v4 = vmul.f32 0.03125, %v1135_v3 }
 0x89e   :  { %v1139_v5 = vadd.f32 1e-12, %v1137_v4 }
 0x8a0   :  { %3084 = vrsqrt.f32 %v1139_v5 }
 0x8a6   :  { %v3083_v6 = vpop.eup %3082 }
 0x8a7   :  { %v1142_v8 = vmul.f32 %v3083_v6, %v1126_v55 }
 0x8a9   :  { %v1150_v10 = vmul.f32 %v2634_v7, %v1142_v8  ;;  %v2645_v8 = vld [vmem:[%s3731_s6 + $0x28] sm:$0xff] }
 0x8aa   :  { %v3085_v11 = vpop.eup %3084 }
 0x8ab   :  { %v1143_v12 = vmul.f32 %v3085_v11, %v1127_v54  ;;  %v1158_v13 = vadd.f32 %v2635_v9, %v1150_v10  ;;  %v2639_v54 = vld [vmem:[%s3774_s25] ss:$0 sm:$0xff]  ;;  %v2646_v10 = vld [vmem:[%s3731_s6 + $0x30] sm:$0xff]  ;;  %v2647_v11 = vld [vmem:[%s3731_s6 + $0x38] sm:$0xff] }
 0x8ad   :  { %v1151_v14 = vmul.f32 %v2634_v7, %v1143_v12  ;;  %2858 = vmatprep.mubr.msk.f32.mxu1 %vm196_vm7, %v1158_v13  ;;  %v2644_v7 = vld [vmem:[%s3731_s6 + $0x20] sm:$0xff]  ;;  %v3016_v12 = vpack.c.bf16 %v2647_v11, %v2646_v10  ;;  %s3134_s6 = scalar_lea.vmem %s2571_s13, 256 }
 0x8ae   :  { %p3135_p5 = scmp.ne.s32.totalorder %s2571_s13, %s3134_s6  ;;  %p3140_p7 = scmp.lt.s32.totalorder %s3134_s6, %s3134_s6 }
 0x8af   :  { %v1159_v16 = vadd.f32 %v2635_v9, %v1151_v14  ;;  %v3012_v9 = vpack.c.bf16 %v2645_v8, %v2644_v7 }
 0x8b0   :  { %p3141_p8 = por %p3140_p7, %p3139_p6 }
 0x8b1   :  { %2859 = vmatmul.mubr.msk.f32.vlgmr.msra.gmra.mrb[12].mxu1 %vm196_vm7, %v1159_v16  ;;  %3013 = vmatprep.subr.bf16.mxu1 %v3012_v9 }
 0x8b2   :  { %3015 = vmatpush3.bf16.msra.mxu1 %v3012_v9  ;;  %p3142_p9 = pnand %p3141_p8, %p3135_p5 }
 0x8b3   :  { %3017 = vmatprep.subr.bf16.mxu1 %v3016_v12 }
 0x8b6   :  { %3019 = vmatpush3.bf16.msra.mxu1 %v3016_v12 }
 0x8b7   :  { %2891 = vmatprep.subr.mxu1 %v3161_v20 }
 0x984   :  { %v2860_v32 = vpop.f32.mrb[12].mxu1 }
 0x985   :  { %v1244_v33 = vadd.f32 %v2860_v32, %v2636_v31  ;;  %v1238_v34 = vpop.f32.mrb[13].mxu1  ;;  %v2672_v32 = vld [vmem:[%s3732_s7 + $0x1] ss:$0 sm:$0xff] }
 0x986   :  { %v1239_v35 = vadd.f32 %v2636_v31, %v1238_v34 }
 0x987   :  { %v1248_v36 = vmul.f32 %v1244_v33, %v1244_v33 }
 0x988   :  { %v1247_v37 = vmul.f32 %v1239_v35, %v1239_v35 }
 0x989   :  { %v1250_v38 = vmul.f32 %v1248_v36, %v1244_v33 }
 0x98a   :  { %v1249_v39 = vmul.f32 %v1247_v37, %v1239_v35 }
 0x98b   :  { %v1252_v40 = vmul.f32 0.044715, %v1250_v38 }
 0x98c   :  { %v1251_v41 = vmul.f32 0.044715, %v1249_v39 }
 0x98d   :  { %v1254_v42 = vadd.f32 %v1252_v40, %v1244_v33 }
 0x98e   :  { %v1253_v43 = vadd.f32 %v1251_v41, %v1239_v35 }
 0x98f   :  { %v1256_v44 = vmul.f32 0.7978846, %v1254_v42 }
 0x990   :  { %v1255_v45 = vmul.f32 0.7978846, %v1253_v43 }
 0x991   :  { %3086 = vtanh.f32 %v1256_v44 }
 0x992   :  { %3088 = vtanh.f32 %v1255_v45 }
 0x99b   :  { %v3087_v46 = vpop.eup %3086 }
 0x99c   :  { %v3089_v47 = vpop.eup %3088  ;;  %v1260_v48 = vadd.f32 1.0, %v3087_v46 }
 0x99d   :  { %v1259_v49 = vadd.f32 1.0, %v3089_v47 }
 0x99e   :  { %v1262_v50 = vmul.f32 0.5, %v1260_v48 }
 0x99f   :  { %v1261_v51 = vmul.f32 0.5, %v1259_v49 }
 0x9a0   :  { %v1264_v53 = vmul.f32 %v1262_v50, %v1244_v33 }
 0x9a1   :  { %v1263_v52 = vmul.f32 %v1261_v51, %v1239_v35 }
 0x9a3   :  { %2877 = vmatprep.mubr.msk.f32.mxu0 %vm1271_vm11, %v1263_v52 }
 0x9a4   :  { %2878 = vmatmul.mubr.msk.f32.vlgmr.msra.gmra.mrb[8].mxu0 %vm1271_vm11, %v1264_v53 }
 0x9a5   :  { %2903 = vmatprep.mubr.msk.f32.mxu0 %vm3162_vm8, %v3161_v20 }
 0xa77   :  { %v2879_v55 = vpop.f32.mrb[8].mxu0 }
 0xa78   :  { %v1350_v56 = vadd.f32 %v2879_v55, %v2639_v54  ;;  %v1344_v57 = vpop.f32.mrb[9].mxu0 }
 0xa79   :  { %v1345_v58 = vadd.f32 %v2639_v54, %v1344_v57 }
 0xa7a   :  { %v1354_v19 = vadd.f32 %v1350_v56, %v1159_v16 }
 0xa7b   :  { %v1353_v15 = vadd.f32 %v1345_v58, %v1158_v13 }
 0xa7c   :  { %v1358_v59 = vsel %vm196_vm7, %v1354_v19, 0.0 }
 0xa7d   :  { %1359 = vadd.xlane.f32.xlu1 %v1358_v59  ;;  %v1355_v60 = vsel %vm196_vm7, %v1353_v15, 0.0 }
 0xa7e   :  { %1356 = vadd.xlane.f32.xlu0 %v1355_v60 }
 0xb0a   :  { %v1360_v61 = vpop.xlane.xlu1 %1359 }
 0xb0b   :  { %v1362_v62 = vmul.f32 0.03125, %v1360_v61  ;;  %v1357_v63 = vpop.xlane.xlu0 %1356 }
 0xb0c   :  { %v1361_v0 = vmul.f32 0.03125, %v1357_v63 }
 0xb0d   :  { %v1364_v1 = vsub.f32 %v1354_v19, %v1362_v62 }
 0xb0e   :  { %v1363_v2 = vsub.f32 %v1353_v15, %v1361_v0 }
 0xb0f   :  { %v1366_v3 = vmul.f32 %v1364_v1, %v1364_v1 }
 0xb10   :  { %v1365_v4 = vmul.f32 %v1363_v2, %v1363_v2 }
 0xb11   :  { %v1370_v5 = vsel %vm196_vm7, %v1366_v3, 0.0 }
 0xb12   :  { %1371 = vadd.xlane.f32.xlu1 %v1370_v5  ;;  %v1367_v6 = vsel %vm196_vm7, %v1365_v4, 0.0 }
 0xb13   :  { %1368 = vadd.xlane.f32.xlu0 %v1367_v6 }
 0xb9f   :  { %v1372_v13 = vpop.xlane.xlu1 %1371 }
 0xba0   :  { %v1374_v14 = vmul.f32 0.03125, %v1372_v13  ;;  %v1369_v16 = vpop.xlane.xlu0 %1368 }
 0xba1   :  { %v1373_v17 = vmul.f32 0.03125, %v1369_v16 }
 0xba2   :  { %v1376_v18 = vadd.f32 1e-12, %v1374_v14 }
 0xba3   :  { %v1375_v21 = vadd.f32 1e-12, %v1373_v17 }
 0xba4   :  { %3090 = vrsqrt.f32 %v1376_v18 }
 0xba5   :  { %3092 = vrsqrt.f32 %v1375_v21 }
 0xbae   :  { %v3091_v22 = vpop.eup %3090 }
 0xbaf   :  { %v3093_v24 = vpop.eup %3092  ;;  %v1380_v25 = vmul.f32 %v3091_v22, %v1364_v1 }
 0xbb0   :  { %v1379_v26 = vmul.f32 %v3093_v24, %v1363_v2 }
 0xbb1   :  { %v1388_v28 = vmul.f32 %v2642_v23, %v1380_v25 }
 0xbb2   :  { %v1387_v29 = vmul.f32 %v2642_v23, %v1379_v26 }
 0xbb3   :  { %v3551_v31 = vadd.f32 %v2643_v27, %v1388_v28 }
 0xbb4   :  { %v3549_v30 = vadd.f32 %v2643_v27, %v1387_v29 }
 0xbb6   :  { %2888 = vmatprep.mubr.msk.f32.mxu1 %vm196_vm7, %v3549_v30 }
 0xbb7   :  { %2889 = vmatmul.mubr.msk.f32.vlgmr.msra.gmra.mrb[14].mxu1 %vm196_vm7, %v3551_v31 }
 0xbb8   :  { %2893 = vmatprep.mubr.msk.f32.mxu1 %vm3162_vm8, %v3161_v20 }
 0xc8a   :  { %v2890_v33 = vpop.f32.mrb[14].mxu1 }
 0xc8b   :  { %v3562_v34 = vadd.f32 %v2890_v33, %v2672_v32  ;;  %v1515_v35 = vpop.f32.mrb[15].mxu1 }
 0xc8c   :  { %v3564_v36 = vadd.f32 %v2672_v32, %v1515_v35  ;;  %v2650_v35 = vld [vmem:[%s3733_s8 + $0x28] sm:$0xff] }
 0xc8d   :  { %1528 = vrot.lane.b32.xlu1 %v3562_v34, %s3163_s12 }
 0xc8e   :  { %1525 = vrot.lane.b32.xlu0 %v3564_v36, %s3163_s12 }
 0xc91   :  { %1530 = vrot.lane.b32.xlu1 %v3564_v36, %s3164_s15 }
 0xcff   :  { %v1529_v37 = vpop.permute.xlu1 %1528 }
 0xd00   :  { %1758 = vrot.lane.b32.xlu0 %v1529_v37, %s3164_s15  ;;  %v1526_v38 = vpop.permute.xlu0 %1525 }
 0xd01   :  { %1606 = vrot.lane.b32.xlu1 %v1526_v38, %s3164_s15 }
 0xd03   :  { %v1531_v39 = vpop.permute.xlu1 %1530 }
 0xd04   :  { %2892 = vmatpush3.xpose.msk.msra.mxu1 %vm363_vm9, %v1531_v39 }
 0xd05   :  { %1682 = vrot.lane.b32.xlu1 %v3562_v34, %s3164_s15  ;;  %2896 = vmatprep.subr.mxu1 %v3161_v20 }
 0xd07   :  { %2894 = vmatmul.mubr.msk.f32.vlgmr.msra.gmra.mrb[16].mxu1 %vm363_vm9, %v3564_v36 }
 0xd08   :  { %2898 = vmatprep.mubr.msk.f32.mxu1 %vm3162_vm8, %v3161_v20 }
 0xd72   :  { %v1759_v41 = vpop.permute.xlu0 %1758 }
 0xd73   :  { %v1607_v40 = vpop.permute.xlu1 %1606 }
 0xd74   :  { %2897 = vmatpush3.xpose.msk.msra.mxu1 %vm363_vm9, %v1607_v40 }
 0xd75   :  { %2906 = vmatprep.subr.mxu1 %v3161_v20 }
 0xd77   :  { %2899 = vmatmul.mubr.msk.f32.vlgmr.msra.gmra.mrb[18].mxu1 %vm363_vm9, %v1526_v38  ;;  %v1683_v42 = vpop.permute.xlu1 %1682 }
 0xd78   :  { %2902 = vmatpush3.xpose.msk.msra.mxu0 %vm363_vm9, %v1683_v42  ;;  %2907 = vmatpush3.xpose.msk.msra.mxu1 %vm363_vm9, %v1759_v41 }
 0xd79   :  { %2908 = vmatprep.mubr.msk.f32.mxu1 %vm3162_vm8, %v3161_v20  ;;  %2916 = vmatprep.subr.mxu1 %v3161_v20 }
 0xd7a   :  { %2911 = vmatprep.subr.mxu0 %v3161_v20 }
 0xd7b   :  { %2904 = vmatmul.mubr.msk.f32.vlgmr.msra.gmra.mrb[10].mxu0 %vm363_vm9, %v3562_v34  ;;  %2909 = vmatmul.mubr.msk.f32.vlgmr.msra.gmra.mrb[20].mxu1 %vm363_vm9, %v1529_v37 }
 0xd7c   :  { %2918 = vmatprep.mubr.msk.f32.mxu1 %vm3162_vm8, %v3161_v20  ;;  %2913 = vmatprep.mubr.msk.f32.mxu0 %vm3162_vm8, %v3161_v20 }
 0xdda   :  { %v1602_v43 = vpop.f32.mrb[16].mxu1 }
 0xddb   :  { %v2895_v44 = vpop.f32.mrb[17].mxu1  ;;  %v1834_v48 = vmul.f32 0.25, %v1602_v43 }
 0xddd   :  { %v1838_v56 = vsel %vm670_vm10, %v1834_v48, -inf }
 0xe4a   :  { %v1678_v45 = vpop.f32.mrb[18].mxu1 }
 0xe4b   :  { %v1835_v46 = vmul.f32 0.25, %v1678_v45  ;;  %v2900_v47 = vpop.f32.mrb[19].mxu1 }
 0xe4d   :  { %v1841_v49 = vsel %vm670_vm10, %v1835_v46, -inf }
 0xe4e   :  { %1842 = vmax.xlane.f32.xlu0 %v1841_v49  ;;  %v1754_v50 = vpop.f32.mrb[10].mxu0  ;;  %v1830_v51 = vpop.f32.mrb[20].mxu1 }
 0xe4f   :  { %v1837_v52 = vmul.f32 0.25, %v1830_v51  ;;  %v2905_v53 = vpop.f32.mrb[11].mxu0  ;;  %v2910_v54 = vpop.f32.mrb[21].mxu1  ;;  %v1836_v55 = vmul.f32 0.25, %v1754_v50  ;;  %v2687_v51 = vld [vmem:[%s3734_s9 + $0x1] ss:$0 sm:$0xff] }
 0xe51   :  { %v1847_v57 = vsel %vm670_vm10, %v1837_v52, -inf  ;;  %v1844_v58 = vsel %vm670_vm10, %v1836_v55, -inf }
 0xe52   :  { %1839 = vmax.xlane.f32.xlu0 %v1838_v56  ;;  %1848 = vmax.xlane.f32.xlu1 %v1847_v57 }
 0xe56   :  { %1845 = vmax.xlane.f32.xlu0 %v1844_v58 }
 0xedb   :  { %v1843_v19 = vpop.xlane.xlu0 %1842 }
 0xedc   :  { %v1851_v15 = vsub.f32 %v1835_v46, %v1843_v19 }
 0xede   :  { %v1856_v59 = vmul.f32 1.442695, %v1851_v15 }
 0xedf   :  { %v1849_v60 = vpop.xlane.xlu1 %1848  ;;  %v1840_v3 = vpop.xlane.xlu0 %1839 }
 0xee0   :  { %3094 = vpow2.f32 %v1856_v59  ;;  %v1853_v61 = vsub.f32 %v1837_v52, %v1849_v60  ;;  %v1850_v7 = vsub.f32 %v1834_v48, %v1840_v3  ;;  %v2657_v3 = vld [vmem:[%s3769_s18 + $0x28] sm:$0xff] }
 0xee2   :  { %v1860_v62 = vmul.f32 1.442695, %v1853_v61  ;;  %v1854_v8 = vmul.f32 1.442695, %v1850_v7 }
 0xee3   :  { %v1846_v4 = vpop.xlane.xlu0 %1845 }
 0xee4   :  { %3096 = vpow2.f32 %v1860_v62  ;;  %v1852_v5 = vsub.f32 %v1836_v55, %v1846_v4 }
 0xee6   :  { %v1858_v6 = vmul.f32 1.442695, %v1852_v5  ;;  %v2658_v5 = vld [vmem:[%s3769_s18 + $0x30] sm:$0xff] }
 0xee8   :  { %3098 = vpow2.f32 %v1858_v6  ;;  %v2659_v6 = vld [vmem:[%s3769_s18 + $0x38] sm:$0xff] }
 0xee9   :  { %3100 = vpow2.f32 %v1854_v8  ;;  %v3032_v7 = vpack.c.bf16 %v2659_v6, %v2658_v5 }
 0xeea   :  { %v3095_v63 = vpop.eup %3094 }
 0xeeb   :  { %v1865_v0 = vsel %vm670_vm10, %v3095_v63, 0.0 }
 0xeec   :  { %1866 = vadd.xlane.f32.xlu0 %v1865_v0 }
 0xeee   :  { %v3097_v1 = vpop.eup %3096 }
 0xeef   :  { %v1871_v2 = vsel %vm670_vm10, %v3097_v1, 0.0 }
 0xef0   :  { %1872 = vadd.xlane.f32.xlu1 %v1871_v2 }
 0xef2   :  { %v3099_v9 = vpop.eup %3098 }
 0xef3   :  { %v1868_v10 = vsel %vm670_vm10, %v3099_v9, 0.0  ;;  %v3101_v11 = vpop.eup %3100 }
 0xef4   :  { %v1862_v12 = vsel %vm670_vm10, %v3101_v11, 0.0 }
 0xf01   :  { %2110 = vrot.lane.b32.xlu1 %v1529_v37, %s3165_s21  ;;  %v2651_v37 = vld [vmem:[%s3733_s8 + $0x30] sm:$0xff] }
 0xf02   :  { %1958 = vrot.lane.b32.xlu0 %v1526_v38, %s3165_s21 }
 0xf21   :  { %1869 = vadd.xlane.f32.xlu0 %v1868_v10 }
 0xf25   :  { %1863 = vadd.xlane.f32.xlu1 %v1862_v12 }
 0xf36   :  { %2034 = vrot.lane.b32.xlu1 %v3562_v34, %s3165_s21  ;;  %v2649_v34 = vld [vmem:[%s3733_s8 + $0x20] sm:$0xff] }
 0xf37   :  { %1882 = vrot.lane.b32.xlu0 %v3564_v36, %s3165_s21  ;;  %v3020_v36 = vpack.c.bf16 %v2650_v35, %v2649_v34  ;;  %v2665_v35 = vld [vmem:[%s3772_s3 + $0x60] sm:$0xff] }
 0xf79   :  { %v1867_v13 = vpop.xlane.xlu0 %1866 }
 0xf7a   :  { %3102 = vrcp.f32 %v1867_v13 }
 0xf7d   :  { %v1959_v14 = vpop.permute.xlu0 %1958  ;;  %v1873_v16 = vpop.xlane.xlu1 %1872 }
 0xf7e   :  { %2917 = vmatpush3.msra.mxu1 %v1959_v14  ;;  %3104 = vrcp.f32 %v1873_v16  ;;  %v2690_v16 = vld [vmem:[%s3770_s4 + $0x1] ss:$0 sm:$0xff] }
 0xf7f   :  { %2926 = vmatprep.subr.mxu1 %v3161_v20 }
 0xf81   :  { %v2111_v21 = vpop.permute.xlu1 %2110 }
 0xf84   :  { %v3103_v17 = vpop.eup %3102 }
 0xf85   :  { %v1879_v18 = vmul.f32 %v3103_v17, %v3095_v63 }
 0xf87   :  { %2919 = vmatmul.mubr.msk.f32.vlgmr.msra.gmra.mrb[22].mxu1 %vm670_vm10, %v1879_v18  ;;  %v2691_v18 = vld [vmem:[%s3771_s2 + $0x1] ss:$0 sm:$0xff] }
 0xf88   :  { %2927 = vmatpush3.msra.mxu1 %v2111_v21  ;;  %2928 = vmatprep.mubr.msk.f32.mxu1 %vm3162_vm8, %v3161_v20  ;;  %v3105_v22 = vpop.eup %3104 }
 0xf89   :  { %v1881_v23 = vmul.f32 %v3105_v22, %v3097_v1 }
 0xf8b   :  { %2929 = vmatmul.mubr.msk.f32.vlgmr.msra.gmra.mrb[24].mxu1 %vm670_vm10, %v1881_v23 }
 0xfae   :  { %v1870_v24 = vpop.xlane.xlu0 %1869 }
 0xfb2   :  { %v1883_v25 = vpop.permute.xlu0 %1882  ;;  %v1864_v26 = vpop.xlane.xlu1 %1863 }
 0xfb3   :  { %2912 = vmatpush3.msra.mxu0 %v1883_v25  ;;  %3106 = vrcp.f32 %v1864_v26 }
 0xfb4   :  { %2921 = vmatprep.subr.mxu0 %v3161_v20  ;;  %3108 = vrcp.f32 %v1870_v24 }
 0xfb6   :  { %v2035_v32 = vpop.permute.xlu1 %2034 }
 0xfbd   :  { %v3107_v27 = vpop.eup %3106 }
 0xfbe   :  { %v1878_v28 = vmul.f32 %v3107_v27, %v3101_v11  ;;  %v3109_v29 = vpop.eup %3108  ;;  %v2661_v27 = vld [vmem:[%s3772_s3 + $0x40] sm:$0xff] }
 0xfbf   :  { %v1880_v33 = vmul.f32 %v3109_v29, %v3099_v9 }
 0xfc0   :  { %2914 = vmatmul.mubr.msk.f32.vlgmr.msra.gmra.mrb[12].mxu0 %vm670_vm10, %v1878_v28  ;;  %v2662_v28 = vld [vmem:[%s3772_s3 + $0x48] sm:$0xff] }
 0xfc1   :  { %2922 = vmatpush3.msra.mxu0 %v2035_v32  ;;  %2923 = vmatprep.mubr.msk.f32.mxu0 %vm3162_vm8, %v3161_v20  ;;  %v2652_v20 = vld [vmem:[%s3733_s8 + $0x38] sm:$0xff]  ;;  %v3036_v29 = vpack.c.bf16 %v2662_v28, %v2661_v27  ;;  %v2663_v32 = vld [vmem:[%s3772_s3 + $0x50] sm:$0xff]  ;;  %v2699_v27 = vld [vmem:[%s3776_s11 + $0x1] ss:$0 sm:$0xff] }
 0xfc2   :  { %3021 = vmatprep.subr.bf16.mxu0 %v3020_v36  ;;  %v3024_v38 = vpack.c.bf16 %v2652_v20, %v2651_v37  ;;  %v2667_v20 = vld [vmem:[%s3772_s3 + $0x70] sm:$0xff] }
 0xfc4   :  { %2924 = vmatmul.mubr.msk.f32.vlgmr.msra.gmra.mrb[14].mxu0 %vm670_vm10, %v1880_v33  ;;  %v2664_v33 = vld [vmem:[%s3772_s3 + $0x58] sm:$0xff] }
 0xfc5   :  { %3023 = vmatpush3.bf16.msra.mxu0 %v3020_v36  ;;  %v3040_v34 = vpack.c.bf16 %v2664_v33, %v2663_v32  ;;  %v2666_v36 = vld [vmem:[%s3772_s3 + $0x68] sm:$0xff] }
 0xfc6   :  { %3025 = vmatprep.subr.bf16.mxu0 %v3024_v38  ;;  %v3044_v37 = vpack.c.bf16 %v2666_v36, %v2665_v35 }
 0xfc9   :  { %3027 = vmatpush3.bf16.msra.mxu0 %v3024_v38  ;;  %v2668_v38 = vld [vmem:[%s3772_s3 + $0x78] sm:$0xff] }
 0xfca   :  { %3037 = vmatprep.subr.bf16.mxu0 %v3036_v29 }
0x105a   :  { %v2030_v39 = vpop.f32.mrb[22].mxu1 }
0x105b   :  { %v2920_v40 = vpop.f32.mrb[23].mxu1  ;;  %2187 = vrot.lane.b32.xlu1 %v2030_v39, %s3166_s1  ;;  %v3048_v39 = vpack.c.bf16 %v2668_v38, %v2667_v20 }
0x105c   :  { %v2692_v40 = vld [vmem:[%s3773_s22 + $0x1] ss:$0 sm:$0xff] }
0x105e   :  { %v2182_v41 = vpop.f32.mrb[24].mxu1 }
0x105f   :  { %2192 = vrot.lane.b32.xlu1 %v2182_v41, %s3166_s1  ;;  %v2930_v42 = vpop.f32.mrb[25].mxu1 }
0x1093   :  { %v1954_v43 = vpop.f32.mrb[12].mxu0 }
0x1094   :  { %v2915_v44 = vpop.f32.mrb[13].mxu0 }
0x1097   :  { %v2106_v45 = vpop.f32.mrb[14].mxu0 }
0x1098   :  { %v2925_v46 = vpop.f32.mrb[15].mxu0 }
0x10cd   :  { %v2188_v47 = vpop.permute.xlu1 %2187 }
0x10ce   :  { %v2190_v48 = vsel %vm363_vm9, %v1954_v43, %v2188_v47 }
0x10cf   :  { %2939 = vmatprep.mubr.msk.f32.mxu0 %vm196_vm7, %v2190_v48 }
0x10d1   :  { %v2193_v49 = vpop.permute.xlu1 %2192 }
0x10d2   :  { %v2195_v50 = vsel %vm363_vm9, %v2106_v45, %v2193_v49 }
0x10d3   :  { %2940 = vmatmul.mubr.msk.f32.vlgmr.msra.gmra.mrb[16].mxu0 %vm196_vm7, %v2195_v50 }
0x10d4   :  { %3039 = vmatpush3.bf16.msra.mxu0 %v3036_v29 }
0x10d5   :  { %3041 = vmatprep.subr.bf16.mxu0 %v3040_v34 }
0x10d8   :  { %3043 = vmatpush3.bf16.msra.mxu0 %v3040_v34 }
0x10d9   :  { %3045 = vmatprep.subr.bf16.mxu0 %v3044_v37 }
0x10dc   :  { %3047 = vmatpush3.bf16.msra.mxu0 %v3044_v37 }
0x10dd   :  { %3049 = vmatprep.subr.bf16.mxu0 %v3048_v39 }
0x10e0   :  { %3051 = vmatpush3.bf16.msra.mxu0 %v3048_v39 }
0x11a6   :  { %v2941_v52 = vpop.f32.mrb[16].mxu0 }
0x11a7   :  { %v2280_v53 = vadd.f32 %v2941_v52, %v2687_v51  ;;  %v2274_v54 = vpop.f32.mrb[17].mxu0 }
0x11a8   :  { %v2275_v55 = vadd.f32 %v2687_v51, %v2274_v54 }
0x11a9   :  { %v2284_v56 = vadd.f32 %v2280_v53, %v3551_v31 }
0x11aa   :  { %v2283_v57 = vadd.f32 %v2275_v55, %v3549_v30  ;;  %v2656_v30 = vld [vmem:[%s3769_s18 + $0x20] sm:$0xff] }
0x11ab   :  { %v2288_v58 = vsel %vm196_vm7, %v2284_v56, 0.0  ;;  %v3028_v4 = vpack.c.bf16 %v2657_v3, %v2656_v30 }
0x11ac   :  { %2289 = vadd.xlane.f32.xlu1 %v2288_v58  ;;  %v2285_v19 = vsel %vm196_vm7, %v2283_v57, 0.0 }
0x11ad   :  { %2286 = vadd.xlane.f32.xlu0 %v2285_v19  ;;  %3029 = vmatprep.subr.bf16.mxu1 %v3028_v4 }
0x11ae   :  { %3031 = vmatpush3.bf16.msra.mxu1 %v3028_v4 }
0x11af   :  { %3033 = vmatprep.subr.bf16.mxu1 %v3032_v7 }
0x11b2   :  { %3035 = vmatpush3.bf16.msra.mxu1 %v3032_v7 }
0x1239   :  { %v2290_v15 = vpop.xlane.xlu1 %2289 }
0x123a   :  { %v2292_v59 = vmul.f32 0.03125, %v2290_v15  ;;  %v2287_v60 = vpop.xlane.xlu0 %2286 }
0x123b   :  { %v2291_v61 = vmul.f32 0.03125, %v2287_v60 }
0x123c   :  { %v2294_v62 = vsub.f32 %v2284_v56, %v2292_v59 }
0x123d   :  { %v2293_v63 = vsub.f32 %v2283_v57, %v2291_v61  ;;  %v2695_v61 = vld [vmem:[%s3774_s25 + $0x1] ss:$0 sm:$0xff] }
0x123e   :  { %v2296_v2 = vmul.f32 %v2294_v62, %v2294_v62 }
0x123f   :  { %v2295_v0 = vmul.f32 %v2293_v63, %v2293_v63 }
0x1240   :  { %v2300_v31 = vsel %vm196_vm7, %v2296_v2, 0.0 }
0x1241   :  { %v2297_v1 = vsel %vm196_vm7, %v2295_v0, 0.0 }
0x1242   :  { %2298 = vadd.xlane.f32.xlu0 %v2297_v1 }
0x1246   :  { %2301 = vadd.xlane.f32.xlu0 %v2300_v31 }
0x12cf   :  { %v2299_v8 = vpop.xlane.xlu0 %2298 }
0x12d0   :  { %v2303_v9 = vmul.f32 0.03125, %v2299_v8 }
0x12d2   :  { %v2305_v10 = vadd.f32 1e-12, %v2303_v9 }
0x12d3   :  { %v2302_v11 = vpop.xlane.xlu0 %2301 }
0x12d4   :  { %3110 = vrsqrt.f32 %v2305_v10  ;;  %v2304_v12 = vmul.f32 0.03125, %v2302_v11 }
0x12d6   :  { %v2306_v13 = vadd.f32 1e-12, %v2304_v12 }
0x12d8   :  { %3112 = vrsqrt.f32 %v2306_v13 }
0x12de   :  { %v3111_v14 = vpop.eup %3110 }
0x12df   :  { %v2309_v17 = vmul.f32 %v3111_v14, %v2293_v63 }
0x12e1   :  { %v2317_v21 = vmul.f32 %v2690_v16, %v2309_v17 }
0x12e2   :  { %v3113_v22 = vpop.eup %3112 }
0x12e3   :  { %v2310_v23 = vmul.f32 %v3113_v22, %v2294_v62  ;;  %v2325_v24 = vadd.f32 %v2691_v18, %v2317_v21 }
0x12e5   :  { %v2318_v25 = vmul.f32 %v2690_v16, %v2310_v23  ;;  %2950 = vmatprep.mubr.msk.f32.mxu1 %vm196_vm7, %v2325_v24 }
0x12e7   :  { %v2326_v26 = vadd.f32 %v2691_v18, %v2318_v25 }
0x12e9   :  { %2951 = vmatmul.mubr.msk.f32.vlgmr.msra.gmra.mrb[26].mxu1 %vm196_vm7, %v2326_v26 }
0x13bc   :  { %v2952_v41 = vpop.f32.mrb[26].mxu1 }
0x13bd   :  { %v2411_v42 = vadd.f32 %v2952_v41, %v2692_v40  ;;  %v2405_v43 = vpop.f32.mrb[27].mxu1 }
0x13be   :  { %v2406_v44 = vadd.f32 %v2692_v40, %v2405_v43 }
0x13bf   :  { %v2415_v45 = vmul.f32 %v2411_v42, %v2411_v42 }
0x13c0   :  { %v2414_v46 = vmul.f32 %v2406_v44, %v2406_v44 }
0x13c1   :  { %v2417_v47 = vmul.f32 %v2415_v45, %v2411_v42 }
0x13c2   :  { %v2416_v48 = vmul.f32 %v2414_v46, %v2406_v44 }
0x13c3   :  { %v2419_v49 = vmul.f32 0.044715, %v2417_v47 }
0x13c4   :  { %v2418_v50 = vmul.f32 0.044715, %v2416_v48 }
0x13c5   :  { %v2421_v51 = vadd.f32 %v2419_v49, %v2411_v42 }
0x13c6   :  { %v2420_v52 = vadd.f32 %v2418_v50, %v2406_v44 }
0x13c7   :  { %v2423_v53 = vmul.f32 0.7978846, %v2421_v51 }
0x13c8   :  { %v2422_v54 = vmul.f32 0.7978846, %v2420_v52 }
0x13c9   :  { %3114 = vtanh.f32 %v2423_v53 }
0x13ca   :  { %3116 = vtanh.f32 %v2422_v54 }
0x13d3   :  { %v3115_v55 = vpop.eup %3114 }
0x13d4   :  { %v3117_v56 = vpop.eup %3116  ;;  %v2427_v57 = vadd.f32 1.0, %v3115_v55 }
0x13d5   :  { %v2426_v58 = vadd.f32 1.0, %v3117_v56 }
0x13d6   :  { %v2429_v19 = vmul.f32 0.5, %v2427_v57 }
0x13d7   :  { %v2428_v15 = vmul.f32 0.5, %v2426_v58 }
0x13d8   :  { %v2431_v60 = vmul.f32 %v2429_v19, %v2411_v42 }
0x13d9   :  { %v2430_v59 = vmul.f32 %v2428_v15, %v2406_v44 }
0x13db   :  { %2969 = vmatprep.mubr.msk.f32.mxu0 %vm1271_vm11, %v2430_v59 }
0x13dc   :  { %2970 = vmatmul.mubr.msk.f32.vlgmr.msra.gmra.mrb[18].mxu0 %vm1271_vm11, %v2431_v60 }
0x14af   :  { %v2971_v62 = vpop.f32.mrb[18].mxu0 }
0x14b0   :  { %v2516_v63 = vadd.f32 %v2971_v62, %v2695_v61  ;;  %v2510_v0 = vpop.f32.mrb[19].mxu0 }
0x14b1   :  { %v2511_v1 = vadd.f32 %v2695_v61, %v2510_v0 }
0x14b2   :  { %v2520_v2 = vadd.f32 %v2516_v63, %v2326_v26 }
0x14b3   :  { %v2519_v31 = vadd.f32 %v2511_v1, %v2325_v24  ;;  %v2698_v24 = vld [vmem:[%s3775_s28 + $0x1] ss:$0 sm:$0xff] }
0x14b4   :  { %v2524_v30 = vsel %vm196_vm7, %v2520_v2, 0.0 }
0x14b5   :  { %2525 = vadd.xlane.f32.xlu1 %v2524_v30  ;;  %v2521_v3 = vsel %vm196_vm7, %v2519_v31, 0.0 }
0x14b6   :  { %2522 = vadd.xlane.f32.xlu0 %v2521_v3 }
0x1542   :  { %v2526_v4 = vpop.xlane.xlu1 %2525 }
0x1543   :  { %v2528_v5 = vmul.f32 0.03125, %v2526_v4  ;;  %v2523_v6 = vpop.xlane.xlu0 %2522 }
0x1544   :  { %v2527_v7 = vmul.f32 0.03125, %v2523_v6 }
0x1545   :  { %v2530_v8 = vsub.f32 %v2520_v2, %v2528_v5 }
0x1546   :  { %v2529_v9 = vsub.f32 %v2519_v31, %v2527_v7 }
0x1547   :  { %v2532_v10 = vmul.f32 %v2530_v8, %v2530_v8 }
0x1548   :  { %v2531_v11 = vmul.f32 %v2529_v9, %v2529_v9 }
0x1549   :  { %v2536_v12 = vsel %vm196_vm7, %v2532_v10, 0.0 }
0x154a   :  { %2537 = vadd.xlane.f32.xlu1 %v2536_v12  ;;  %v2533_v13 = vsel %vm196_vm7, %v2531_v11, 0.0 }
0x154b   :  { %2534 = vadd.xlane.f32.xlu0 %v2533_v13 }
0x15d7   :  { %v2538_v14 = vpop.xlane.xlu1 %2537 }
0x15d8   :  { %v2540_v16 = vmul.f32 0.03125, %v2538_v14  ;;  %v2535_v17 = vpop.xlane.xlu0 %2534 }
0x15d9   :  { %v2539_v18 = vmul.f32 0.03125, %v2535_v17 }
0x15da   :  { %v2542_v21 = vadd.f32 1e-12, %v2540_v16 }
0x15db   :  { %v2541_v22 = vadd.f32 1e-12, %v2539_v18 }
0x15dc   :  { %3118 = vrsqrt.f32 %v2542_v21 }
0x15dd   :  { %3120 = vrsqrt.f32 %v2541_v22 }
0x15e6   :  { %v3119_v23 = vpop.eup %3118 }
0x15e7   :  { %v3121_v25 = vpop.eup %3120  ;;  %v2546_v26 = vmul.f32 %v3119_v23, %v2530_v8 }
0x15e8   :  { %v2545_v28 = vmul.f32 %v3121_v25, %v2529_v9 }
0x15e9   :  { %v2554_v29 = vmul.f32 %v2698_v24, %v2546_v26 }
0x15ea   :  { %v2553_v32 = vmul.f32 %v2698_v24, %v2545_v28 }
0x15eb   :  { %v2562_v33 = vadd.f32 %v2699_v27, %v2554_v29 }
0x15ec   :  { %v2561_v34 = vadd.f32 %v2699_v27, %v2553_v32 }
0x15ed   :  { %2564 = vst.msk [vmem:[#allocation5 + $0x8] sm:$0xff] %vm196_vm7, %v2562_v33 }
0x15ee   :  { %2563 = vst.msk [vmem:[#allocation5] sm:$0xff] %vm196_vm7, %v2561_v34 }
0x15ef   :  { %3145 = shalt.err (!%p3142_p9)
}
0x15f0   :  { %s3777_s10 = sld [smem:[#allocation19_spill]] }
0x15f6   :  { %s3146_s14 = scalar_lea.hbm %s3777_s10, 256 }
0x15f7   :  { %p3147_p10 = scmp.ne.s32.totalorder %s3777_s10, %s3146_s14  ;;  %p3150_p11 = scmp.lt.u32.totalorder %s3146_s14, %s3777_s10 }
0x15f9   :  { %p3152_p12 = pnand %p3150_p11, %p3147_p10 }
0x15fb   :  { %3155 = shalt.err (!%p3152_p12)
}
0x15fc   :  { %s3168_s2 = smov 128   ;;  %s3169_s12 = smov 8  }
0x15fd   :  { %2576 = dma.vmem_to_hbm [thread:$0]  %s2571_s13, 256, %s3777_s10, [#allocation3], %s3168_s2, %s3168_s2, %s3169_s12  }
0x15fe   :  { %3158 = dma.done.wait [#allocation3], 256  }
0x15ff   :  { %3159 = vsyncadd [#allocation3], 4294967040 }
0x1600   :  { %2580 = vsyncpa [#allocation3], 1 }
0x1601   :  { %2581 = vsyncpa [#allocation4], 1 }

</bundles_post_ra>
